<compile_context>
chip_gen: v7x
topology: tpu7x:2x2x1
jax: 0.10.0
libtpu: 0.0.40
codegen_flags: <defaults>
</compile_context>

<pallas_src>
from functools import partial

import numpy as np
import jax
import jax.numpy as jnp
from jax.experimental import pallas as pl
from jax.experimental.pallas import tpu as pltpu

F32 = jnp.float32
BF16 = jnp.bfloat16
BN_EPS = 1e-5
LN_EPS = 1e-5
VMEM_LIMIT = 32 * 1024 * 1024

# ViT hyper-parameters (identical for all three ViTs in MSTLoc).
VIT_DIM = 1024
VIT_HEADS = 8
VIT_DH = 64
VIT_PATCH = 7
VIT_MLP = 1024
VIT_DEPTH = 6


def _rup(x, m):
    return ((x + m - 1) // m) * m


def _cdiv(a, b):
    return -(-a // b)


def _pick_block(dim, cap, mult):
    """Largest block <= cap that divides `dim` and is a multiple of `mult`
    (falls back to the full dim, which is always a legal block)."""
    if dim <= cap:
        return dim
    for nblk in range(_cdiv(dim, cap), dim + 1):
        if dim % nblk == 0 and (dim // nblk) % mult == 0:
            return dim // nblk
    return dim


# ----------------------------------------------------------------------------
# Fused matmul: bf16 operands, f32 scratch accumulation, fused scale/bias/act
# and optional fused residual add; output dtype selectable (bf16 intermediates).
# ----------------------------------------------------------------------------
def _matmul_kernel(a_ref, b_ref, s_ref, c_ref, *rest, act, nk, has_res):
    if has_res:
        r_ref, o_ref, acc_ref = rest
    else:
        o_ref, acc_ref = rest

    @pl.when(pl.program_id(2) == 0)
    def _():
        acc_ref[...] = jnp.zeros_like(acc_ref)

    acc_ref[...] += jnp.dot(a_ref[...], b_ref[...],
                            preferred_element_type=jnp.float32)

    @pl.when(pl.program_id(2) == nk - 1)
    def _():
        y = acc_ref[...] * s_ref[...] + c_ref[...]
        if act == "relu":
            y = jnp.maximum(y, 0.0)
        elif act == "gelu":
            # TODO(synk): PyTorch nn.GELU defaults to exact erf-GELU; tanh approx used.
            y = jax.nn.gelu(y, approximate=True)
        if has_res:
            y = y + r_ref[...].astype(jnp.float32)
        o_ref[...] = y.astype(o_ref.dtype)


@partial(jax.jit, static_argnames=("act", "out_dtype"))
def matmul_fused(a, b, scale=None, bias=None, res=None, act="none", out_dtype=F32):
    """out = act((a @ b) * scale + bias) [+ res]; scale/bias broadcast over rows."""
    M, K = a.shape
    _, N = b.shape
    if scale is None:
        scale = jnp.ones((N,), F32)
    if bias is None:
        bias = jnp.zeros((N,), F32)
    bm = _pick_block(M, 1024, 16)
    bn = _pick_block(N, 2048, 128)
    bk = _pick_block(K, 4096, 128)
    nm, nn, nk = M // bm, N // bn, K // bk
    has_res = res is not None

    in_specs = [pl.BlockSpec((bm, bk), lambda i, j, k: (i, k)),
                pl.BlockSpec((bk, bn), lambda i, j, k: (k, j)),
                pl.BlockSpec((1, bn), lambda i, j, k: (0, j)),
                pl.BlockSpec((1, bn), lambda i, j, k: (0, j))]
    args = [a.astype(BF16), b.astype(BF16),
            scale.astype(F32).reshape(1, N), bias.astype(F32).reshape(1, N)]
    if has_res:
        in_specs.append(pl.BlockSpec((bm, bn), lambda i, j, k: (i, j)))
        args.append(res)

    return pl.pallas_call(
        partial(_matmul_kernel, act=act, nk=nk, has_res=has_res),
        out_shape=jax.ShapeDtypeStruct((M, N), out_dtype),
        grid=(nm, nn, nk),
        in_specs=in_specs,
        out_specs=pl.BlockSpec((bm, bn), lambda i, j, k: (i, j)),
        scratch_shapes=[pltpu.VMEM((bm, bn), F32)],
        compiler_params=pltpu.CompilerParams(
            dimension_semantics=("parallel", "parallel", "arbitrary"),
            vmem_limit_bytes=VMEM_LIMIT),
    )(*args)


# ----------------------------------------------------------------------------
# Convolution (+ folded BN, optional ReLU).
#   * fold path: stage taps in a VMEM scratch -> ONE matmul with K = kh*kw*Cin
#   * taps path: per-tap accumulation (used when K=Cin is already MXU-deep)
#   * stem path: XLA im2col + fused matmul (Cin=3)
# ----------------------------------------------------------------------------
def _conv_kernel_taps(x_ref, w_ref, s_ref, b_ref, o_ref, *, shifts, act, block_rows):
    row0 = pl.multiple_of(pl.program_id(1) * block_rows, 16)
    cout = o_ref.shape[-1]
    acc = jnp.zeros((block_rows, cout), jnp.float32)
    for t, sh in enumerate(shifts):
        xt = x_ref[0, pl.ds(row0 + sh, block_rows), :]
        acc = acc + jnp.dot(xt, w_ref[t], preferred_element_type=jnp.float32)
    y = acc * s_ref[...] + b_ref[...]
    if act == "relu":
        y = jnp.maximum(y, 0.0)
    o_ref[0] = y.astype(o_ref.dtype)


def _conv_kernel_fold(x_ref, w_ref, s_ref, b_ref, o_ref, patch_ref, *,
                      shifts, act, block_rows, cin):
    row0 = pl.multiple_of(pl.program_id(1) * block_rows, 16)
    # Stage the kh*kw shifted row-windows side by side in VMEM -> (rows, ntaps*Cin)
    for t, sh in enumerate(shifts):
        patch_ref[:, t * cin:(t + 1) * cin] = x_ref[0, pl.ds(row0 + sh, block_rows), :]
    y = jnp.dot(patch_ref[...], w_ref[...], preferred_element_type=jnp.float32)
    y = y * s_ref[...] + b_ref[...]
    if act == "relu":
        y = jnp.maximum(y, 0.0)
    o_ref[0] = y.astype(o_ref.dtype)


@partial(jax.jit, static_argnames=("padding", "dilation", "act"))
def conv2d(x, w, scale, bias, padding=(0, 0), dilation=(1, 1), act="none"):
    B, H, W, Cin = x.shape
    kh, kw, _, Cout = w.shape
    ph, pw = padding
    dh, dw = dilation
    Ho = H + 2 * ph - dh * (kh - 1)
    Wo = W + 2 * pw - dw * (kw - 1)

    # --- Stem / tiny-Cin path: XLA im2col (fuses into one copy under the outer
    # jit) + one MXU matmul with K = kh*kw*Cin (27 for the RGB stem).
    if Cin < 16 and kh * kw > 1:
        xp = jnp.pad(x, ((0, 0), (ph, ph), (pw, pw), (0, 0))).astype(BF16)
        cols = [xp[:, i * dh:i * dh + Ho, j * dw:j * dw + Wo, :]
                for i in range(kh) for j in range(kw)]
        patches = jnp.concatenate(cols, axis=-1).reshape(B * Ho * Wo, kh * kw * Cin)
        wf = w.astype(BF16).reshape(kh * kw * Cin, Cout)
        y = matmul_fused(patches, wf, scale, bias, act=act, out_dtype=BF16)
        return y.reshape(B, Ho, Wo, Cout)

    # --- Wide-grid path: compute on width = Wp so every tap is a contiguous
    # row-shift of the flattened padded input; crop to Wo afterwards (the crop
    # fuses into the consumer's pad/copy under the whole-model jit).
    Hp, Wp = H + 2 * ph, W + 2 * pw
    R_out = Ho * Wp
    target = 256 if Cout >= 256 else 512
    n_m = max(1, _cdiv(R_out, target))
    block_rows = _rup(_cdiv(R_out, n_m), 16)
    R_out_p = n_m * block_rows

    shifts = tuple(i * dh * Wp + j * dw for i in range(kh) for j in range(kw))
    max_shift = shifts[-1]
    r_in_need = R_out_p + max_shift
    extra_h = max(0, _cdiv(max(0, r_in_need - Hp * Wp), Wp))
    R_in = (Hp + extra_h) * Wp

    xp = jnp.pad(x.astype(BF16), ((0, 0), (ph, ph + extra_h), (pw, pw), (0, 0)))
    x_flat = xp.reshape(B, R_in, Cin)                       # free reshape

    ntaps = kh * kw
    kfold = ntaps * Cin
    # Fold taps into the contraction dim when per-tap K would underfill the MXU.
    fold = (ntaps > 1) and (Cin % 64 == 0) and (Cin <= 128) and (kfold <= 2304)

    common = dict(
        out_shape=jax.ShapeDtypeStruct((B, R_out_p, Cout), BF16),
        grid=(B, n_m),
        out_specs=pl.BlockSpec((1, block_rows, Cout), lambda b, m: (b, m, 0)),
        compiler_params=pltpu.CompilerParams(
            dimension_semantics=("parallel", "parallel"),
            vmem_limit_bytes=VMEM_LIMIT),
    )
    sb_specs = [pl.BlockSpec((1, Cout), lambda b, m: (0, 0)),
                pl.BlockSpec((1, Cout), lambda b, m: (0, 0))]
    s2 = scale.astype(F32).reshape(1, Cout)
    b2 = bias.astype(F32).reshape(1, Cout)

    if fold:
        w_flat = w.astype(BF16).reshape(kfold, Cout)        # free reshape (HWIO)
        out = pl.pallas_call(
            partial(_conv_kernel_fold, shifts=shifts, act=act,
                    block_rows=block_rows, cin=Cin),
            in_specs=[pl.BlockSpec((1, R_in, Cin), lambda b, m: (b, 0, 0)),
                      pl.BlockSpec((kfold, Cout), lambda b, m: (0, 0))] + sb_specs,
            scratch_shapes=[pltpu.VMEM((block_rows, kfold), BF16)],
            **common,
        )(x_flat, w_flat, s2, b2)
    else:
        w_flat = w.astype(BF16).reshape(ntaps, Cin, Cout)
        out = pl.pallas_call(
            partial(_conv_kernel_taps, shifts=shifts, act=act,
                    block_rows=block_rows),
            in_specs=[pl.BlockSpec((1, R_in, Cin), lambda b, m: (b, 0, 0)),
                      pl.BlockSpec((ntaps, Cin, Cout), lambda b, m: (0, 0, 0))]
                     + sb_specs,
            **common,
        )(x_flat, w_flat, s2, b2)

    out = out[:, :R_out].reshape(B, Ho, Wp, Cout)
    if Wp != Wo:
        # TODO(synk): an (Ho, Wo)-indexed in-kernel store (lane-dense for Cout<128)
        # would remove this crop entirely; currently it fuses into the consumer.
        out = out[:, :, :Wo, :]
    return out


def basic_conv(x, p, padding=(0, 0), dilation=(1, 1), act="none"):
    return conv2d(x, p["w"], p["scale"], p["bias"],
                  padding=padding, dilation=dilation, act=act)


# ----------------------------------------------------------------------------
# Elementwise add (+ReLU), max-pool, LayerNorm, attention
# ----------------------------------------------------------------------------
def _ew_kernel(a_ref, b_ref, o_ref, *, op):
    y = a_ref[...].astype(jnp.float32) + b_ref[...].astype(jnp.float32)
    if op == "add_relu":
        y = jnp.maximum(y, 0.0)
    o_ref[...] = y.astype(o_ref.dtype)


@partial(jax.jit, static_argnames=("op",))
def ew_binary(a, b, op="add"):
    shape = a.shape
    total = int(np.prod(shape))
    # lane-dense flat view (>=128 lanes) so stores are unmasked
    L = next((l for l in (1024, 512, 256, 128) if total % l == 0), shape[-1])
    R = total // L
    out = pl.pallas_call(
        partial(_ew_kernel, op=op),
        out_shape=jax.ShapeDtypeStruct((R, L), a.dtype),
        grid=(1,),
        in_specs=[pl.BlockSpec((R, L), lambda i: (0, 0)),
                  pl.BlockSpec((R, L), lambda i: (0, 0))],
        out_specs=pl.BlockSpec((R, L), lambda i: (0, 0)),
    )(a.reshape(R, L), b.astype(a.dtype).reshape(R, L))
    return out.reshape(shape)


def _maxpool_kernel(x_ref, o_ref, *, C):
    x = x_ref[...]                                   # (1, Ho, 2, Wo, 2*C)
    m = jnp.maximum(x[0, :, 0], x[0, :, 1])          # (Ho, Wo, 2*C)
    o_ref[0] = jnp.maximum(m[:, :, :C], m[:, :, C:])


@jax.jit
def maxpool2x2(x):
    B, H, W, C = x.shape
    Ho, Wo = H // 2, W // 2
    xv = x.reshape(B, Ho, 2, Wo, 2 * C)              # layout-preserving view
    return pl.pallas_call(
        partial(_maxpool_kernel, C=C),
        out_shape=jax.ShapeDtypeStruct((B, Ho, Wo, C), x.dtype),
        grid=(B,),
        in_specs=[pl.BlockSpec((1, Ho, 2, Wo, 2 * C), lambda b: (b, 0, 0, 0, 0))],
        out_specs=pl.BlockSpec((1, Ho, Wo, C), lambda b: (b, 0, 0, 0)),
        compiler_params=pltpu.CompilerParams(
            dimension_semantics=("parallel",)),
    )(xv)


def _ln_kernel(x_ref, g_ref, b_ref, o_ref):
    x = x_ref[...].astype(jnp.float32)
    mu = jnp.mean(x, axis=-1, keepdims=True)
    var = jnp.mean(jnp.square(x - mu), axis=-1, keepdims=True)
    y = (x - mu) * jax.lax.rsqrt(var + LN_EPS)
    o_ref[...] = (y * g_ref[...] + b_ref[...]).astype(o_ref.dtype)


@partial(jax.jit, static_argnames=("out_dtype",))
def layernorm(x2d, g, b, out_dtype=F32):
    M, D = x2d.shape
    return pl.pallas_call(
        _ln_kernel,
        out_shape=jax.ShapeDtypeStruct((M, D), out_dtype),
        grid=(1,),
        in_specs=[pl.BlockSpec((M, D), lambda i: (0, 0)),
                  pl.BlockSpec((1, D), lambda i: (0, 0)),
                  pl.BlockSpec((1, D), lambda i: (0, 0))],
        out_specs=pl.BlockSpec((M, D), lambda i: (0, 0)),
    )(x2d, g.reshape(1, D), b.reshape(1, D))


def _attn_kernel(qkv_ref, o_ref, *, heads, dh, scale):
    # qkv_ref: (B, N, 3*heads*dh) packed [q | k | v]; head split done in-kernel.
    inner = heads * dh
    qkv = qkv_ref[...]
    for h in range(heads):
        q = qkv[:, :, h * dh:(h + 1) * dh]
        k = qkv[:, :, inner + h * dh:inner + (h + 1) * dh]
        v = qkv[:, :, 2 * inner + h * dh:2 * inner + (h + 1) * dh]
        s = jax.lax.dot_general(q, k, (((2,), (2,)), ((0,), (0,))),
                                preferred_element_type=jnp.float32) * scale
        m = jnp.max(s, axis=-1, keepdims=True)
        p = jnp.exp(s - m)
        l = jnp.sum(p, axis=-1, keepdims=True)
        o = jax.lax.dot_general(p.astype(v.dtype), v, (((2,), (1,)), ((0,), (0,))),
                                preferred_element_type=jnp.float32)
        o = o * pl.reciprocal(l, approx=True)
        o_ref[:, :, h * dh:(h + 1) * dh] = o.astype(o_ref.dtype)


@partial(jax.jit, static_argnames=("heads", "dh", "scale"))
def mha_attention(qkv, heads, dh, scale):
    B, N, three_inner = qkv.shape
    inner = heads * dh
    return pl.pallas_call(
        partial(_attn_kernel, heads=heads, dh=dh, scale=scale),
        out_shape=jax.ShapeDtypeStruct((B, N, inner), BF16),
        grid=(1,),
        in_specs=[pl.BlockSpec((B, N, three_inner), lambda i: (0, 0, 0))],
        out_specs=pl.BlockSpec((B, N, inner), lambda i: (0, 0, 0)),
    )(qkv.astype(BF16))


# ----------------------------------------------------------------------------
# Bilinear (align_corners=True) resize as two small Pallas matmuls
# ----------------------------------------------------------------------------
def _interp_matrix(size_in, size_out):
    Wm = np.zeros((size_out, size_in), np.float32)
    if size_out == 1:
        Wm[0, 0] = 1.0
        return Wm
    src = np.arange(size_out) * (size_in - 1) / (size_out - 1)
    i0 = np.clip(np.floor(src).astype(np.int64), 0, size_in - 1)
    i1 = np.clip(i0 + 1, 0, size_in - 1)
    f = (src - i0).astype(np.float32)
    Wm[np.arange(size_out), i0] += (1.0 - f)
    Wm[np.arange(size_out), i1] += f
    return Wm


def _resize_rows_kernel(wr_ref, x_ref, o_ref):
    o_ref[0] = jnp.dot(wr_ref[...], x_ref[0],
                       preferred_element_type=jnp.float32).astype(o_ref.dtype)


def _resize_cols_kernel(wc_ref, x_ref, o_ref):
    x = x_ref[...]                              # (R, W, C)
    wc = wc_ref[...]                            # (wo, W)
    wcb = jnp.broadcast_to(wc[None], (x.shape[0], wc.shape[0], wc.shape[1]))
    o = jax.lax.dot_general(wcb, x, (((2,), (1,)), ((0,), (0,))),
                            preferred_element_type=jnp.float32)
    o_ref[...] = o.astype(o_ref.dtype)


@partial(jax.jit, static_argnames=("ho", "wo"))
def bilinear_resize(x, ho, wo):
    """F.interpolate(mode='bilinear', align_corners=True)."""
    B, H, W, C = x.shape
    Wr = jnp.asarray(_interp_matrix(H, ho), BF16)
    Wc = jnp.asarray(_interp_matrix(W, wo), BF16)
    xb = x.astype(BF16)
    t = pl.pallas_call(
        _resize_rows_kernel,
        out_shape=jax.ShapeDtypeStruct((B, ho, W * C), BF16),
        grid=(B,),
        in_specs=[pl.BlockSpec((ho, H), lambda b: (0, 0)),
                  pl.BlockSpec((1, H, W * C), lambda b: (b, 0, 0))],
        out_specs=pl.BlockSpec((1, ho, W * C), lambda b: (b, 0, 0)),
        compiler_params=pltpu.CompilerParams(
            dimension_semantics=("parallel",)),
    )(Wr, xb.reshape(B, H, W * C))
    out = pl.pallas_call(
        _resize_cols_kernel,
        out_shape=jax.ShapeDtypeStruct((B * ho, wo, C), BF16),
        grid=(1,),
        in_specs=[pl.BlockSpec((wo, W), lambda i: (0, 0)),
                  pl.BlockSpec((B * ho, W, C), lambda i: (0, 0, 0))],
        out_specs=pl.BlockSpec((B * ho, wo, C), lambda i: (0, 0, 0)),
    )(Wc, t.reshape(B * ho, W, C))
    return out.reshape(B, ho, wo, C)


# ----------------------------------------------------------------------------
# Deterministic parameter initialization (bf16 matmul weights, f32 scale/bias)
# ----------------------------------------------------------------------------
_KEY_STREAM = None


def _init_keys(seed=42, n=1024):
    global _KEY_STREAM
    _KEY_STREAM = iter(jax.random.split(jax.random.PRNGKey(seed), n))


def nkey():
    return next(_KEY_STREAM)


def init_basic(cin, cout, k):
    """BasicConv2d: conv(bias=False) + BatchNorm2d (eval mode, default stats)."""
    kh, kw = (k, k) if isinstance(k, int) else k
    w = (jax.random.normal(nkey(), (kh, kw, cin, cout), F32)
         * np.sqrt(2.0 / (kh * kw * cin))).astype(BF16)
    scale = jnp.full((cout,), 1.0 / np.sqrt(1.0 + BN_EPS), F32)   # gamma/sqrt(var+eps)
    bias = jnp.zeros((cout,), F32)                                # beta - mean*scale
    return {"w": w, "scale": scale, "bias": bias}


def init_conv_bias(cin, cout, k=3):
    """Plain conv with bias (VGG layers)."""
    w = (jax.random.normal(nkey(), (k, k, cin, cout), F32)
         * np.sqrt(2.0 / (k * k * cin))).astype(BF16)
    return {"w": w, "scale": jnp.ones((cout,), F32), "bias": jnp.zeros((cout,), F32)}


def init_rfb(cin, cout):
    return {
        "b0_0": init_basic(cin, cout, 1),
        "b1_0": init_basic(cin, cout, 1),
        "b1_1": init_basic(cout, cout, (1, 3)),
        "b1_2": init_basic(cout, cout, (3, 1)),
        "b1_3": init_basic(cout, cout, 3),
        "b2_0": init_basic(cin, cout, 1),
        "b2_1": init_basic(cout, cout, (1, 5)),
        "b2_2": init_basic(cout, cout, (5, 1)),
        "b2_3": init_basic(cout, cout, 3),
        "b3_0": init_basic(cin, cout, 1),
        "b3_1": init_basic(cout, cout, (1, 7)),
        "b3_2": init_basic(cout, cout, (7, 1)),
        "b3_3": init_basic(cout, cout, 3),
        "conv_cat": init_basic(4 * cout, cout, 3),
        "conv_res": init_basic(cin, cout, 1),
    }


def init_vit(image_size, patch_size, channels, dim=VIT_DIM, depth=VIT_DEPTH,
             heads=VIT_HEADS, dim_head=VIT_DH, mlp_dim=VIT_MLP):
    patch_dim = channels * patch_size * patch_size
    n = (image_size // patch_size) ** 2
    inner = heads * dim_head
    layers = []
    for _ in range(depth):
        layers.append({
            "ln1_g": jnp.ones((dim,), F32), "ln1_b": jnp.zeros((dim,), F32),
            "qkv_w": (jax.random.normal(nkey(), (dim, 3 * inner), F32)
                      / np.sqrt(dim)).astype(BF16),
            "out_w": (jax.random.normal(nkey(), (inner, dim), F32)
                      / np.sqrt(inner)).astype(BF16),
            "out_b": jnp.zeros((dim,), F32),
            "ln2_g": jnp.ones((dim,), F32), "ln2_b": jnp.zeros((dim,), F32),
            "mlp_w1": (jax.random.normal(nkey(), (dim, mlp_dim), F32)
                       / np.sqrt(dim)).astype(BF16),
            "mlp_b1": jnp.zeros((mlp_dim,), F32),
            "mlp_w2": (jax.random.normal(nkey(), (mlp_dim, dim), F32)
                       / np.sqrt(mlp_dim)).astype(BF16),
            "mlp_b2": jnp.zeros((dim,), F32),
        })
    return {
        "patch_w": (jax.random.normal(nkey(), (patch_dim, dim), F32)
                    / np.sqrt(patch_dim)).astype(BF16),
        "patch_b": jnp.zeros((dim,), F32),
        "cls": jax.random.normal(nkey(), (1, 1, dim), F32) * 0.02,
        "pos": jax.random.normal(nkey(), (1, n + 1, dim), F32) * 0.02,
        "layers": layers,
        "lnf_g": jnp.ones((dim,), F32), "lnf_b": jnp.zeros((dim,), F32),
    }


def init_mstloc(class_nums=4):
    _init_keys(42, 1024)
    P = {}
    P["vgg"] = {
        "conv1": [init_conv_bias(3, 64), init_conv_bias(64, 64)],
        "conv2": [init_conv_bias(64, 128), init_conv_bias(128, 128)],
        "conv3": [init_conv_bias(128, 256), init_conv_bias(256, 256), init_conv_bias(256, 256)],
        "conv4_1": [init_conv_bias(256, 512), init_conv_bias(512, 512), init_conv_bias(512, 512)],
        "conv5_2": [init_conv_bias(512, 512), init_conv_bias(512, 512), init_conv_bias(512, 512)],
    }
    P["rfb2_1"] = init_rfb(256, 64)
    P["rfb3_1"] = init_rfb(512, 64)
    P["rfb4_1"] = init_rfb(512, 64)
    P["edge_conv1"] = init_basic(128, 64, 1)
    P["edge_conv2"] = init_basic(64, 64, 3)
    P["edge_conv3"] = init_basic(64, 64, 3)
    P["ra4_conv2"] = init_basic(128, 128, 5)
    P["ra4_conv3"] = init_basic(128, 256, 5)
    P["ra4_conv4"] = init_basic(256, 256, 5)
    P["ra3_conv2"] = init_basic(128, 64, 3)
    P["ra3_conv3"] = init_basic(64, 64, 3)
    P["ra3_conv4"] = init_basic(64, 64, 3)
    P["ra2_conv2"] = init_basic(128, 64, 3)
    P["ra2_conv3"] = init_basic(64, 32, 3)
    P["ra2_conv4"] = init_basic(32, 16, 3)
    P["vit1"] = init_vit(28, 7, 16)
    P["vit2"] = init_vit(14, 7, 64)
    P["vit3"] = init_vit(7, 7, 256)
    P["head_w"] = (jax.random.normal(nkey(), (3072, class_nums), F32)
                   / np.sqrt(3072)).astype(BF16)
    P["head_b"] = jnp.zeros((class_nums,), F32)
    return P


# ----------------------------------------------------------------------------
# Sub-module forwards
# ----------------------------------------------------------------------------
def rfb_forward(x, p):
    x0 = basic_conv(x, p["b0_0"])
    x1 = basic_conv(x, p["b1_0"])
    x1 = basic_conv(x1, p["b1_1"], padding=(0, 1))
    x1 = basic_conv(x1, p["b1_2"], padding=(1, 0))
    x1 = basic_conv(x1, p["b1_3"], padding=(3, 3), dilation=(3, 3))
    x2 = basic_conv(x, p["b2_0"])
    x2 = basic_conv(x2, p["b2_1"], padding=(0, 2))
    x2 = basic_conv(x2, p["b2_2"], padding=(2, 0))
    x2 = basic_conv(x2, p["b2_3"], padding=(5, 5), dilation=(5, 5))
    x3 = basic_conv(x, p["b3_0"])
    x3 = basic_conv(x3, p["b3_1"], padding=(0, 3))
    x3 = basic_conv(x3, p["b3_2"], padding=(3, 0))
    x3 = basic_conv(x3, p["b3_3"], padding=(7, 7), dilation=(7, 7))
    xcat = basic_conv(jnp.concatenate([x0, x1, x2, x3], axis=-1),
                      p["conv_cat"], padding=(1, 1))
    xres = basic_conv(x, p["conv_res"])
    return ew_binary(xcat, xres, op="add_relu")


def vit_forward(x, p):
    B, H, W, C = x.shape
    ps, heads, dh, dim = VIT_PATCH, VIT_HEADS, VIT_DH, VIT_DIM
    inner = heads * dh
    nh, nw = H // ps, W // ps
    n = nh * nw
    patches = (x.reshape(B, nh, ps, nw, ps, C)
                 .transpose(0, 1, 3, 2, 4, 5)
                 .reshape(B * n, ps * ps * C))
    tok = matmul_fused(patches, p["patch_w"], None, p["patch_b"])
    tok = tok.reshape(B, n, dim)
    cls = jnp.broadcast_to(p["cls"], (B, 1, dim))
    xs = jnp.concatenate([cls, tok], axis=1) + p["pos"][:, :n + 1]
    # dropout / emb_dropout: identity in eval mode
    N = n + 1
    scale = float(dh) ** -0.5
    xs2d = xs.reshape(B * N, dim)                       # f32 residual stream
    for layer in p["layers"]:
        h = layernorm(xs2d, layer["ln1_g"], layer["ln1_b"], out_dtype=BF16)
        qkv = matmul_fused(h, layer["qkv_w"], out_dtype=BF16)           # (B*N, 3*inner)
        o = mha_attention(qkv.reshape(B, N, 3 * inner), heads, dh, scale)
        xs2d = matmul_fused(o.reshape(B * N, inner), layer["out_w"], None,
                            layer["out_b"], res=xs2d, out_dtype=F32)    # +residual

        h = layernorm(xs2d, layer["ln2_g"], layer["ln2_b"], out_dtype=BF16)
        mid = matmul_fused(h, layer["mlp_w1"], None, layer["mlp_b1"],
                           act="gelu", out_dtype=BF16)
        xs2d = matmul_fused(mid, layer["mlp_w2"], None, layer["mlp_b2"],
                            res=xs2d, out_dtype=F32)                    # +residual
    cls_out = xs2d.reshape(B, N, dim)[:, 0]             # 'cls' pooling -> [B, dim]
    return layernorm(cls_out, p["lnf_g"], p["lnf_b"], out_dtype=F32)


def mstloc_forward(x_nhwc, P):
    def vgg_block(h, convs, pool):
        if pool:
            h = maxpool2x2(h)
        for cp in convs:
            h = basic_conv(h, cp, padding=(1, 1), act="relu")
        return h

    h = vgg_block(x_nhwc, P["vgg"]["conv1"], False)   # 64  @112
    x1 = vgg_block(h, P["vgg"]["conv2"], True)        # 128 @56
    x2 = vgg_block(x1, P["vgg"]["conv3"], True)       # 256 @28
    x3 = vgg_block(x2, P["vgg"]["conv4_1"], True)     # 512 @14
    x4 = vgg_block(x3, P["vgg"]["conv5_2"], True)     # 512 @7

    x2 = rfb_forward(x2, P["rfb2_1"])                 # 64 @28
    x3 = rfb_forward(x3, P["rfb3_1"])                 # 64 @14
    x4 = rfb_forward(x4, P["rfb4_1"])                 # 64 @7

    e = basic_conv(x1, P["edge_conv1"])
    e = basic_conv(e, P["edge_conv2"], padding=(1, 1))
    edge = basic_conv(e, P["edge_conv3"], padding=(1, 1))   # 64 @56

    s2 = x2.shape[1]
    xt1 = jnp.concatenate([x2, bilinear_resize(edge, ho=s2, wo=s2)], axis=-1)
    xt1 = basic_conv(xt1, P["ra2_conv2"], padding=(1, 1), act="relu")
    xt1 = basic_conv(xt1, P["ra2_conv3"], padding=(1, 1), act="relu")
    xt1 = basic_conv(xt1, P["ra2_conv4"], padding=(1, 1), act="relu")
    x_t1 = vit_forward(xt1, P["vit1"])

    s3 = x3.shape[1]
    xt2 = jnp.concatenate([x3, bilinear_resize(edge, ho=s3, wo=s3)], axis=-1)
    xt2 = basic_conv(xt2, P["ra3_conv2"], padding=(1, 1), act="relu")
    xt2 = basic_conv(xt2, P["ra3_conv3"], padding=(1, 1), act="relu")
    xt2 = basic_conv(xt2, P["ra3_conv4"], padding=(1, 1), act="relu")
    x_t2 = vit_forward(xt2, P["vit2"])

    s4 = x4.shape[1]
    xt3 = jnp.concatenate([x4, bilinear_resize(edge, ho=s4, wo=s4)], axis=-1)
    xt3 = basic_conv(xt3, P["ra4_conv2"], padding=(2, 2), act="relu")
    xt3 = basic_conv(xt3, P["ra4_conv3"], padding=(2, 2), act="relu")
    xt3 = basic_conv(xt3, P["ra4_conv4"], padding=(2, 2), act="relu")
    x_t3 = vit_forward(xt3, P["vit3"])

    xcat = jnp.concatenate([x_t1, x_t2, x_t3], axis=-1)       # [B, 3072]
    logits = matmul_fused(xcat, P["head_w"], None, P["head_b"])
    return xcat, logits, x_t1, x_t2, x_t3, xcat


# ----------------------------------------------------------------------------
if __name__ == "__main__":
    B, class_nums = 2, 4
    # PyTorch-style NCHW input; 112x112 makes the ViT image sizes (28/14/7) consistent.
    x_nchw = jax.random.normal(jax.random.PRNGKey(0), (B, 3, 112, 112), F32)
    x = jnp.transpose(x_nchw, (0, 2, 3, 1))   # NCHW -> NHWC

    P = init_mstloc(class_nums)
    # Whole-model jit: fuses pad/crop/cast glue around every Pallas call and removes
    # per-op dispatch (the ViT section is dispatch-bound otherwise).
    fwd = jax.jit(mstloc_forward)
    outs = fwd(x, P)
    outs = jax.block_until_ready(outs)

    assert outs[0].shape == (B, 3072)
    assert outs[1].shape == (B, class_nums)
    assert outs[2].shape == (B, 1024)
    assert outs[3].shape == (B, 1024)
    assert outs[4].shape == (B, 1024)
    assert outs[5].shape == (B, 3072)
    assert all(bool(jnp.isfinite(o).all()) for o in outs)
    print("KERNEL_OK")
</pallas_src>

<mosaic_0001>
module attributes {stable_mosaic.version = 11 : i64} {
  func.func @_matmul_kernel(%arg0: i32, %arg1: i32, %arg2: i32, %arg3: memref<896x27xbf16, #tpu.memory_space<vmem>>, %arg4: memref<27x64xbf16, #tpu.memory_space<vmem>>, %arg5: memref<1x64xf32, #tpu.memory_space<vmem>>, %arg6: memref<1x64xf32, #tpu.memory_space<vmem>>, %arg7: memref<896x64xbf16, #tpu.memory_space<vmem>>, %arg8: memref<896x64xf32, #tpu.memory_space<vmem>>) attributes {dimension_semantics = [#tpu.dimension_semantics<parallel>, #tpu.dimension_semantics<parallel>, #tpu.dimension_semantics<arbitrary>], iteration_bounds = array<i64: 28, 1, 1>, scalar_prefetch = 0 : i64, scratch_operands = 1 : i64, tpu.core_type = #tpu.core_type<tc>, window_params = [{transform_indices = @transform_0, window_bounds = array<i64: 896, 27>}, {transform_indices = @transform_1, window_bounds = array<i64: 27, 64>}, {transform_indices = @transform_2, window_bounds = array<i64: 1, 64>}, {transform_indices = @transform_3, window_bounds = array<i64: 1, 64>}, {transform_indices = @transform_4, window_bounds = array<i64: 896, 64>}]} {
    %c0_i32 = arith.constant 0 : i32
    %0 = arith.cmpi eq, %arg2, %c0_i32 : i32
    %1 = arith.extui %0 : i1 to i32
    %c0_i32_0 = arith.constant 0 : i32
    %2 = arith.cmpi ne, %1, %c0_i32_0 : i32
    scf.if %2 {
      %cst_10 = arith.constant 0.000000e+00 : f32
      %12 = vector.broadcast %cst_10 : f32 to vector<896x64xf32>
      %c0_11 = arith.constant 0 : index
      %c0_12 = arith.constant 0 : index
      %13 = vector.load %arg8[%c0_11, %c0_12] : memref<896x64xf32, #tpu.memory_space<vmem>>, vector<896x64xf32>
      tpu.vector_store %arg8[%c0_11, %c0_12], %12 {strides = array<i32>} : memref<896x64xf32, #tpu.memory_space<vmem>>, vector<896x64xf32>,
    } else {
    }
    %c0 = arith.constant 0 : index
    %c0_1 = arith.constant 0 : index
    %3 = vector.load %arg8[%c0, %c0_1] : memref<896x64xf32, #tpu.memory_space<vmem>>, vector<896x64xf32>
    %c0_2 = arith.constant 0 : index
    %c0_3 = arith.constant 0 : index
    %4 = vector.load %arg3[%c0_2, %c0_3] : memref<896x27xbf16, #tpu.memory_space<vmem>>, vector<896x27xbf16>
    %c0_4 = arith.constant 0 : index
    %c0_5 = arith.constant 0 : index
    %5 = vector.load %arg4[%c0_4, %c0_5] : memref<27x64xbf16, #tpu.memory_space<vmem>>, vector<27x64xbf16>
    %cst = arith.constant dense<0.000000e+00> : vector<896x64xf32>
    %6 = tpu.matmul %4, %5, %cst {dimension_numbers = #tpu.dot_dimension_numbers<[1], [0], [0], [1], [0, 0, 1, 1], [], []>} : vector<896x27xbf16>, vector<27x64xbf16>, vector<896x64xf32> -> vector<896x64xf32>
    %7 = arith.addf %3, %6 : vector<896x64xf32>
    %c0_6 = arith.constant 0 : index
    %c0_7 = arith.constant 0 : index
    %8 = vector.load %arg8[%c0_6, %c0_7] : memref<896x64xf32, #tpu.memory_space<vmem>>, vector<896x64xf32>
    tpu.vector_store %arg8[%c0_6, %c0_7], %7 {strides = array<i32>} : memref<896x64xf32, #tpu.memory_space<vmem>>, vector<896x64xf32>,
    %c0_i32_8 = arith.constant 0 : i32
    %9 = arith.cmpi eq, %arg2, %c0_i32_8 : i32
    %10 = arith.extui %9 : i1 to i32
    %c0_i32_9 = arith.constant 0 : i32
    %11 = arith.cmpi ne, %10, %c0_i32_9 : i32
    scf.if %11 {
      %c0_10 = arith.constant 0 : index
      %c0_11 = arith.constant 0 : index
      %12 = vector.load %arg8[%c0_10, %c0_11] : memref<896x64xf32, #tpu.memory_space<vmem>>, vector<896x64xf32>
      %c0_12 = arith.constant 0 : index
      %c0_13 = arith.constant 0 : index
      %13 = vector.load %arg5[%c0_12, %c0_13] : memref<1x64xf32, #tpu.memory_space<vmem>>, vector<1x64xf32>
      %14 = vector.broadcast %13 : vector<1x64xf32> to vector<896x64xf32>
      %15 = arith.mulf %12, %14 : vector<896x64xf32>
      %c0_14 = arith.constant 0 : index
      %c0_15 = arith.constant 0 : index
      %16 = vector.load %arg6[%c0_14, %c0_15] : memref<1x64xf32, #tpu.memory_space<vmem>>, vector<1x64xf32>
      %17 = vector.broadcast %16 : vector<1x64xf32> to vector<896x64xf32>
      %18 = arith.addf %15, %17 : vector<896x64xf32>
      %cst_16 = arith.constant 0.000000e+00 : f32
      %19 = vector.broadcast %cst_16 : f32 to vector<896x64xf32>
      %20 = arith.maximumf %18, %19 : vector<896x64xf32>
      %21 = arith.truncf %20 : vector<896x64xf32> to vector<896x64xbf16>
      %c0_17 = arith.constant 0 : index
      %c0_18 = arith.constant 0 : index
      %22 = vector.load %arg7[%c0_17, %c0_18] : memref<896x64xbf16, #tpu.memory_space<vmem>>, vector<896x64xbf16>
      tpu.vector_store %arg7[%c0_17, %c0_18], %21 {strides = array<i32>} : memref<896x64xbf16, #tpu.memory_space<vmem>>, vector<896x64xbf16>,
    } else {
    }
    return
  }
  func.func @transform_0(%arg0: i32, %arg1: i32, %arg2: i32) -> (i32, i32) {
    %c0_i32 = arith.constant 0 : i32
    return %arg0, %arg2 : i32, i32
  }
  func.func @transform_1(%arg0: i32, %arg1: i32, %arg2: i32) -> (i32, i32) {
    %c0_i32 = arith.constant 0 : i32
    return %arg2, %arg1 : i32, i32
  }
  func.func @transform_2(%arg0: i32, %arg1: i32, %arg2: i32) -> (i32, i32) {
    %c0_i32 = arith.constant 0 : i32
    %c0_i32_0 = arith.constant 0 : i32
    return %c0_i32, %arg1 : i32, i32
  }
  func.func @transform_3(%arg0: i32, %arg1: i32, %arg2: i32) -> (i32, i32) {
    %c0_i32 = arith.constant 0 : i32
    %c0_i32_0 = arith.constant 0 : i32
    return %c0_i32, %arg1 : i32, i32
  }
  func.func @transform_4(%arg0: i32, %arg1: i32, %arg2: i32) -> (i32, i32) {
    %c0_i32 = arith.constant 0 : i32
    return %arg0, %arg1 : i32, i32
  }
}

</mosaic_0001>

<bundles_post_ra>
// kernel: matmul_fused.1
= control target key start
LH: loop header
LB: loop body
LE: loop exit
PB: predicated region body
PF: predicated region fallthrough
CT: control target
= control target key end

     0   :  { %s3637_s15 = smov 0   ;;  %s3639_s16 = smov 0   ;;  %s4825_s0 = inlined_call_operand.vmem [shape: bf16[25088,27], index: 0, kind: input, shape index: {}]   ;;  %s4826_s1 = inlined_call_operand.vmem [shape: bf16[27,64], index: 1, kind: input, shape index: {}]   ;;  %s4827_s2 = inlined_call_operand.vmem [shape: f32[1,64], index: 2, kind: input, shape index: {}]   ;;  %s4828_s3 = inlined_call_operand.vmem [shape: f32[1,64], index: 3, kind: input, shape index: {}]   ;;  %s4829_s4 = inlined_call_operand.vmem [shape: bf16[25088,64], index: 4, kind: output, shape index: {}]  }
   0x1   :  { %s3641_s17 = smov 0  }
   0x2 LB: > { %s33_s18 = sadd.s32 1, %s3604_s16  ;;  %p2975_p0 = scmp.ge.s32.totalorder %s3608_s17, 1  ;;  %s3608_s17 = sphi %s3641_s17, %s14_s17   ;;  %s3604_s16 = sphi %s3639_s16, %s4840_s16   ;;  %s3600_s15 = sphi %s3637_s15, %s4839_s15  }
   0x3   : > { %p35_p1 = scmp.ge.s32.totalorder %s33_s18, 28  ;;  %p221_p2 = scmp.lt.s32.totalorder %s3608_s17, 29 }
   0x5   : > { %s4842_s18 = smov (%p35_p1, %s33_s18), 0  ;;  %p222_p3 = pnand %p2975_p0, %p221_p2 }
   0x7   : > { %225 = sbr.rel (%p222_p3) target bundleno = 407 (0x197), region = 36 }
   0xe   : > { %v3524_v0 = vld [vmem:[%s4826_s1] sm:$0xff]   ;;  %vm1106_vm0 = vcmask 1044480   ;;  %v3663_v1 = vld [vmem:[%s4826_s1 + $0x8] sm:$0x3f]   ;;  %vm1107_vm1 = vcmask 1045504   ;;  %s267_s23 = smul.u32 112, %s3600_s15 }
   0xf   : > { %3378 = vmatprep.subr.bf16.mxu0 %v3524_v0  ;;  %3494 = vmatprep.subr.bf16.mxu1 %v3524_v0  ;;  %vm305_vm2 = vcmask 523264   ;;  %v3610_v2 = vmov 65535   ;;  %v3611_v5 = vmov 0.0   ;;  %vm937_vm3 = vcmask 220160  }
  0x10   : > { %3379 = vmatpush3.bf16.msra.mxu0 %v3524_v0  ;;  %3496 = vmatpush3.bf16.msra.mxu1 %v3524_v0  ;;  %v1108_v3 = vsel %vm1106_vm0, 4294967295, %v3610_v2  ;;  %p3670_p4 = scmp.lt.s32.totalorder %s267_s23, 3135  ;;  %308 = vst.msk [vmem:[#allocation2 + $0x10] sm:$0xff] %vm305_vm2, %v3611_v5  ;;  %306 = vst.msk [vmem:[#allocation2] sm:$0xff] %vm305_vm2, %v3611_v5  ;;  %vm2732_vm4 = vcmask 519168  }
  0x11   : > { %v3666_v4 = vsel %vm1107_vm1, %v1108_v3, 0  ;;  %307 = vst.msk [vmem:[#allocation2 + $0x8] sm:$0xff] %vm305_vm2, %v3611_v5  ;;  %309 = vst.msk [vmem:[#allocation2 + $0x18] sm:$0xff] %vm305_vm2, %v3611_v5 }
  0x12   : > { %310 = vst.msk [vmem:[#allocation2 + $0x20] sm:$0xff] %vm305_vm2, %v3611_v5  ;;  %311 = vst.msk [vmem:[#allocation2 + $0x28] sm:$0xff] %vm305_vm2, %v3611_v5  ;;  %v1111_v6 = vand.u32 %v3663_v1, %v3666_v4  ;;  %s4844_s23 = smov (!%p3670_p4, %s267_s23), 3135 }
  0x13   : > { %312 = vst.msk [vmem:[#allocation2 + $0x30] sm:$0xff] %vm305_vm2, %v3611_v5  ;;  %313 = vst.msk [vmem:[#allocation2 + $0x38] sm:$0xff] %vm305_vm2, %v3611_v5  ;;  %s2976_s25 = sshll.u32 %s4844_s23, 2 }
  0x14   : > { %314 = vst.msk [vmem:[#allocation2 + $0x40] sm:$0xff] %vm305_vm2, %v3611_v5  ;;  %315 = vst.msk [vmem:[#allocation2 + $0x48] sm:$0xff] %vm305_vm2, %v3611_v5  ;;  %3380 = vmatprep.subr.bf16.mxu0 %v1111_v6  ;;  %3495 = vmatprep.subr.bf16.mxu1 %v1111_v6  ;;  %s3912_s28 = scalar_lea.vmem %s4825_s0, %s2976_s25  ;;  %s4070_s9 = scalar_lea.vmem %s4829_s4, %s2976_s25 }
  0x15   : > { %316 = vst.msk [vmem:[#allocation2 + $0x50] sm:$0xff] %vm305_vm2, %v3611_v5  ;;  %317 = vst.msk [vmem:[#allocation2 + $0x58] sm:$0xff] %vm305_vm2, %v3611_v5  ;;  %3381 = vmatpush3.bf16.msra.mxu0 %v1111_v6  ;;  %3497 = vmatpush3.bf16.msra.mxu1 %v1111_v6  ;;  %v3526_v7 = vld [vmem:[%s3912_s28] sm:$0xff]   ;;  %v3528_v9 = vld [vmem:[%s3912_s28 + $0x8] sm:$0xff]  }
  0x16   : > { %318 = vst.msk [vmem:[#allocation2 + $0x60] sm:$0xff] %vm305_vm2, %v3611_v5  ;;  %319 = vst.msk [vmem:[#allocation2 + $0x68] sm:$0xff] %vm305_vm2, %v3611_v5  ;;  %v3527_v8 = vld [vmem:[%s3912_s28 + $0xe0] sm:$0xff]   ;;  %3382 = vmatprep.mubr.msk.bf16.mxu0 %vm937_vm3, %v3526_v7  ;;  %v3529_v10 = vld [vmem:[%s3912_s28 + $0xe8] sm:$0xff]  }
  0x17   : > { %320 = vst.msk [vmem:[#allocation2 + $0x70] sm:$0xff] %vm305_vm2, %v3611_v5  ;;  %321 = vst.msk [vmem:[#allocation2 + $0x78] sm:$0xff] %vm305_vm2, %v3611_v5  ;;  %3438 = vmatprep.mubr.msk.bf16.mxu1 %vm937_vm3, %v3527_v8  ;;  %v3530_v11 = vld [vmem:[%s3912_s28 + $0x10] sm:$0xff]   ;;  %v3532_v13 = vld [vmem:[%s3912_s28 + $0x18] sm:$0xff]  }
  0x18   : > { %322 = vst.msk [vmem:[#allocation2 + $0x80] sm:$0xff] %vm305_vm2, %v3611_v5  ;;  %323 = vst.msk [vmem:[#allocation2 + $0x88] sm:$0xff] %vm305_vm2, %v3611_v5  ;;  %3383 = vmatmul.mubr.msk.bf16.vlgmr.msra.gmra.mrb[0].mxu0 %vm937_vm3, %v3528_v9  ;;  %3439 = vmatmul.mubr.msk.bf16.vlgmr.msra.gmra.mrb[0].mxu1 %vm937_vm3, %v3529_v10  ;;  %v3531_v12 = vld [vmem:[%s3912_s28 + $0xf0] sm:$0xff]   ;;  %v3533_v14 = vld [vmem:[%s3912_s28 + $0xf8] sm:$0xff]  }
  0x19   : > { %324 = vst.msk [vmem:[#allocation2 + $0x90] sm:$0xff] %vm305_vm2, %v3611_v5  ;;  %325 = vst.msk [vmem:[#allocation2 + $0x98] sm:$0xff] %vm305_vm2, %v3611_v5  ;;  %3386 = vmatprep.mubr.msk.bf16.mxu0 %vm937_vm3, %v3530_v11  ;;  %3442 = vmatprep.mubr.msk.bf16.mxu1 %vm937_vm3, %v3531_v12  ;;  %v3534_v15 = vld [vmem:[%s3912_s28 + $0x20] sm:$0xff]   ;;  %v3536_v17 = vld [vmem:[%s3912_s28 + $0x28] sm:$0xff]  }
  0x1a   : > { %326 = vst.msk [vmem:[#allocation2 + $0xa0] sm:$0xff] %vm305_vm2, %v3611_v5  ;;  %327 = vst.msk [vmem:[#allocation2 + $0xa8] sm:$0xff] %vm305_vm2, %v3611_v5  ;;  %v3535_v16 = vld [vmem:[%s3912_s28 + $0x100] sm:$0xff]   ;;  %v3537_v18 = vld [vmem:[%s3912_s28 + $0x108] sm:$0xff]  }
  0x1b   : > { %328 = vst.msk [vmem:[#allocation2 + $0xb0] sm:$0xff] %vm305_vm2, %v3611_v5  ;;  %329 = vst.msk [vmem:[#allocation2 + $0xb8] sm:$0xff] %vm305_vm2, %v3611_v5  ;;  %v3538_v19 = vld [vmem:[%s3912_s28 + $0x30] sm:$0xff]   ;;  %v3540_v21 = vld [vmem:[%s3912_s28 + $0x38] sm:$0xff]  }
  0x1c   : > { %330 = vst.msk [vmem:[#allocation2 + $0xc0] sm:$0xff] %vm305_vm2, %v3611_v5  ;;  %331 = vst.msk [vmem:[#allocation2 + $0xc8] sm:$0xff] %vm305_vm2, %v3611_v5  ;;  %v3539_v20 = vld [vmem:[%s3912_s28 + $0x110] sm:$0xff]   ;;  %v3541_v22 = vld [vmem:[%s3912_s28 + $0x118] sm:$0xff]  }
  0x1d   : > { %332 = vst.msk [vmem:[#allocation2 + $0xd0] sm:$0xff] %vm305_vm2, %v3611_v5  ;;  %333 = vst.msk [vmem:[#allocation2 + $0xd8] sm:$0xff] %vm305_vm2, %v3611_v5  ;;  %v3542_v23 = vld [vmem:[%s3912_s28 + $0x40] sm:$0xff]   ;;  %v3544_v25 = vld [vmem:[%s3912_s28 + $0x48] sm:$0xff]  }
  0x1e   : > { %334 = vst.msk [vmem:[#allocation2 + $0xe0] sm:$0xff] %vm305_vm2, %v3611_v5  ;;  %335 = vst.msk [vmem:[#allocation2 + $0xe8] sm:$0xff] %vm305_vm2, %v3611_v5  ;;  %v3543_v24 = vld [vmem:[%s3912_s28 + $0x120] sm:$0xff]   ;;  %v3545_v26 = vld [vmem:[%s3912_s28 + $0x128] sm:$0xff]  }
  0x1f   : > { %336 = vst.msk [vmem:[#allocation2 + $0xf0] sm:$0xff] %vm305_vm2, %v3611_v5  ;;  %337 = vst.msk [vmem:[#allocation2 + $0xf8] sm:$0xff] %vm305_vm2, %v3611_v5  ;;  %v3546_v27 = vld [vmem:[%s3912_s28 + $0x50] sm:$0xff]   ;;  %v3548_v29 = vld [vmem:[%s3912_s28 + $0x58] sm:$0xff]  }
  0x20   : > { %338 = vst.msk [vmem:[#allocation2 + $0x100] sm:$0xff] %vm305_vm2, %v3611_v5  ;;  %339 = vst.msk [vmem:[#allocation2 + $0x108] sm:$0xff] %vm305_vm2, %v3611_v5  ;;  %3387 = vmatmul.mubr.msk.bf16.gmra.mrb[4].mxu0 %vm937_vm3, %v3532_v13  ;;  %3443 = vmatmul.mubr.msk.bf16.gmra.mrb[4].mxu1 %vm937_vm3, %v3533_v14  ;;  %v3547_v28 = vld [vmem:[%s3912_s28 + $0x130] sm:$0xff]   ;;  %v3549_v30 = vld [vmem:[%s3912_s28 + $0x138] sm:$0xff]  }
  0x21   : > { %340 = vst.msk [vmem:[#allocation2 + $0x110] sm:$0xff] %vm305_vm2, %v3611_v5  ;;  %341 = vst.msk [vmem:[#allocation2 + $0x118] sm:$0xff] %vm305_vm2, %v3611_v5  ;;  %3390 = vmatprep.mubr.msk.bf16.mxu0 %vm937_vm3, %v3534_v15  ;;  %3446 = vmatprep.mubr.msk.bf16.mxu1 %vm937_vm3, %v3535_v16  ;;  %v3550_v31 = vld [vmem:[%s3912_s28 + $0x60] sm:$0xff]   ;;  %v3552_v33 = vld [vmem:[%s3912_s28 + $0x68] sm:$0xff]  }
  0x22   : > { %342 = vst.msk [vmem:[#allocation2 + $0x120] sm:$0xff] %vm305_vm2, %v3611_v5  ;;  %343 = vst.msk [vmem:[#allocation2 + $0x128] sm:$0xff] %vm305_vm2, %v3611_v5  ;;  %v3551_v32 = vld [vmem:[%s3912_s28 + $0x140] sm:$0xff]   ;;  %v3553_v34 = vld [vmem:[%s3912_s28 + $0x148] sm:$0xff]  }
  0x23   : > { %344 = vst.msk [vmem:[#allocation2 + $0x130] sm:$0xff] %vm305_vm2, %v3611_v5  ;;  %345 = vst.msk [vmem:[#allocation2 + $0x138] sm:$0xff] %vm305_vm2, %v3611_v5  ;;  %v3554_v35 = vld [vmem:[%s3912_s28 + $0x70] sm:$0xff]   ;;  %v3556_v37 = vld [vmem:[%s3912_s28 + $0x78] sm:$0xff]  }
  0x24   : > { %346 = vst.msk [vmem:[#allocation2 + $0x140] sm:$0xff] %vm305_vm2, %v3611_v5  ;;  %347 = vst.msk [vmem:[#allocation2 + $0x148] sm:$0xff] %vm305_vm2, %v3611_v5  ;;  %v3555_v36 = vld [vmem:[%s3912_s28 + $0x150] sm:$0xff]   ;;  %v3557_v38 = vld [vmem:[%s3912_s28 + $0x158] sm:$0xff]  }
  0x25   : > { %348 = vst.msk [vmem:[#allocation2 + $0x150] sm:$0xff] %vm305_vm2, %v3611_v5  ;;  %349 = vst.msk [vmem:[#allocation2 + $0x158] sm:$0xff] %vm305_vm2, %v3611_v5  ;;  %v3558_v39 = vld [vmem:[%s3912_s28 + $0x80] sm:$0xff]   ;;  %v3560_v41 = vld [vmem:[%s3912_s28 + $0x88] sm:$0xff]  }
  0x26   : > { %350 = vst.msk [vmem:[#allocation2 + $0x160] sm:$0xff] %vm305_vm2, %v3611_v5  ;;  %351 = vst.msk [vmem:[#allocation2 + $0x168] sm:$0xff] %vm305_vm2, %v3611_v5  ;;  %v3559_v40 = vld [vmem:[%s3912_s28 + $0x160] sm:$0xff]   ;;  %v3561_v42 = vld [vmem:[%s3912_s28 + $0x168] sm:$0xff]  }
  0x27   : > { %352 = vst.msk [vmem:[#allocation2 + $0x170] sm:$0xff] %vm305_vm2, %v3611_v5  ;;  %353 = vst.msk [vmem:[#allocation2 + $0x178] sm:$0xff] %vm305_vm2, %v3611_v5  ;;  %v3562_v43 = vld [vmem:[%s3912_s28 + $0x90] sm:$0xff]   ;;  %v3564_v45 = vld [vmem:[%s3912_s28 + $0x98] sm:$0xff]  }
  0x28   : > { %354 = vst.msk [vmem:[#allocation2 + $0x180] sm:$0xff] %vm305_vm2, %v3611_v5  ;;  %355 = vst.msk [vmem:[#allocation2 + $0x188] sm:$0xff] %vm305_vm2, %v3611_v5  ;;  %3391 = vmatmul.mubr.msk.bf16.gmra.mrb[8].mxu0 %vm937_vm3, %v3536_v17  ;;  %3447 = vmatmul.mubr.msk.bf16.gmra.mrb[8].mxu1 %vm937_vm3, %v3537_v18  ;;  %v3563_v44 = vld [vmem:[%s3912_s28 + $0x170] sm:$0xff]   ;;  %v3565_v46 = vld [vmem:[%s3912_s28 + $0x178] sm:$0xff]  }
  0x29   : > { %356 = vst.msk [vmem:[#allocation2 + $0x190] sm:$0xff] %vm305_vm2, %v3611_v5  ;;  %357 = vst.msk [vmem:[#allocation2 + $0x198] sm:$0xff] %vm305_vm2, %v3611_v5  ;;  %3394 = vmatprep.mubr.msk.bf16.mxu0 %vm937_vm3, %v3538_v19  ;;  %3450 = vmatprep.mubr.msk.bf16.mxu1 %vm937_vm3, %v3539_v20  ;;  %v3566_v47 = vld [vmem:[%s3912_s28 + $0xa0] sm:$0xff]   ;;  %v3568_v49 = vld [vmem:[%s3912_s28 + $0xa8] sm:$0xff]  }
  0x2a   : > { %358 = vst.msk [vmem:[#allocation2 + $0x1a0] sm:$0xff] %vm305_vm2, %v3611_v5  ;;  %359 = vst.msk [vmem:[#allocation2 + $0x1a8] sm:$0xff] %vm305_vm2, %v3611_v5  ;;  %v3567_v48 = vld [vmem:[%s3912_s28 + $0x180] sm:$0xff]   ;;  %v3569_v50 = vld [vmem:[%s3912_s28 + $0x188] sm:$0xff]  }
  0x2b   : > { %360 = vst.msk [vmem:[#allocation2 + $0x1b0] sm:$0xff] %vm305_vm2, %v3611_v5  ;;  %361 = vst.msk [vmem:[#allocation2 + $0x1b8] sm:$0xff] %vm305_vm2, %v3611_v5  ;;  %v3570_v51 = vld [vmem:[%s3912_s28 + $0xb0] sm:$0xff]   ;;  %v3572_v53 = vld [vmem:[%s3912_s28 + $0xb8] sm:$0xff]  }
  0x2c   : > { %362 = vst.msk [vmem:[#allocation2 + $0x1c0] sm:$0xff] %vm305_vm2, %v3611_v5  ;;  %363 = vst.msk [vmem:[#allocation2 + $0x1c8] sm:$0xff] %vm305_vm2, %v3611_v5  ;;  %v3571_v52 = vld [vmem:[%s3912_s28 + $0x190] sm:$0xff]   ;;  %v3573_v54 = vld [vmem:[%s3912_s28 + $0x198] sm:$0xff]  }
  0x2d   : > { %364 = vst.msk [vmem:[#allocation2 + $0x1d0] sm:$0xff] %vm305_vm2, %v3611_v5  ;;  %365 = vst.msk [vmem:[#allocation2 + $0x1d8] sm:$0xff] %vm305_vm2, %v3611_v5  ;;  %v3574_v55 = vld [vmem:[%s3912_s28 + $0xc0] sm:$0xff]   ;;  %v3576_v57 = vld [vmem:[%s3912_s28 + $0xc8] sm:$0xff]  }
  0x2e   : > { %366 = vst.msk [vmem:[#allocation2 + $0x1e0] sm:$0xff] %vm305_vm2, %v3611_v5  ;;  %367 = vst.msk [vmem:[#allocation2 + $0x1e8] sm:$0xff] %vm305_vm2, %v3611_v5  ;;  %v3575_v56 = vld [vmem:[%s3912_s28 + $0x1a0] sm:$0xff]   ;;  %v3577_v58 = vld [vmem:[%s3912_s28 + $0x1a8] sm:$0xff]  }
  0x2f   : > { %368 = vst.msk [vmem:[#allocation2 + $0x1f0] sm:$0xff] %vm305_vm2, %v3611_v5  ;;  %369 = vst.msk [vmem:[#allocation2 + $0x1f8] sm:$0xff] %vm305_vm2, %v3611_v5  ;;  %v3578_v59 = vld [vmem:[%s3912_s28 + $0xd0] sm:$0xff]   ;;  %v3580_v61 = vld [vmem:[%s3912_s28 + $0xd8] sm:$0xff]  }
  0x30   : > { %370 = vst.msk [vmem:[#allocation2 + $0x200] sm:$0xff] %vm305_vm2, %v3611_v5  ;;  %371 = vst.msk [vmem:[#allocation2 + $0x208] sm:$0xff] %vm305_vm2, %v3611_v5  ;;  %3395 = vmatmul.mubr.msk.bf16.gmra.mrb[12].mxu0 %vm937_vm3, %v3540_v21  ;;  %3451 = vmatmul.mubr.msk.bf16.gmra.mrb[12].mxu1 %vm937_vm3, %v3541_v22  ;;  %v3579_v60 = vld [vmem:[%s3912_s28 + $0x1b0] sm:$0xff]   ;;  %v3581_v62 = vld [vmem:[%s3912_s28 + $0x1b8] sm:$0xff]  }
  0x31   : > { %372 = vst.msk [vmem:[#allocation2 + $0x210] sm:$0xff] %vm305_vm2, %v3611_v5  ;;  %373 = vst.msk [vmem:[#allocation2 + $0x218] sm:$0xff] %vm305_vm2, %v3611_v5  ;;  %3398 = vmatprep.mubr.msk.bf16.mxu0 %vm937_vm3, %v3542_v23  ;;  %3454 = vmatprep.mubr.msk.bf16.mxu1 %vm937_vm3, %v3543_v24  ;;  %v420_v63 = vld [vmem:[#allocation2 + $0x10] sm:$0xff]  ;;  %v418_v1 = vld [vmem:[#allocation2] sm:$0xff] }
  0x32   : > { %374 = vst.msk [vmem:[#allocation2 + $0x220] sm:$0xff] %vm305_vm2, %v3611_v5  ;;  %375 = vst.msk [vmem:[#allocation2 + $0x228] sm:$0xff] %vm305_vm2, %v3611_v5  ;;  %v421_v4 = vld [vmem:[#allocation2 + $0x18] sm:$0xff]  ;;  %v419_v9 = vld [vmem:[#allocation2 + $0x8] sm:$0xff] }
  0x33   : > { %376 = vst.msk [vmem:[#allocation2 + $0x230] sm:$0xff] %vm305_vm2, %v3611_v5  ;;  %377 = vst.msk [vmem:[#allocation2 + $0x238] sm:$0xff] %vm305_vm2, %v3611_v5  ;;  %v474_v3 = vld [vmem:[#allocation2 + $0x1c0] sm:$0xff]  ;;  %v475_v14 = vld [vmem:[#allocation2 + $0x1c8] sm:$0xff] }
  0x34   : > { %378 = vst.msk [vmem:[#allocation2 + $0x240] sm:$0xff] %vm305_vm2, %v3611_v5  ;;  %379 = vst.msk [vmem:[#allocation2 + $0x248] sm:$0xff] %vm305_vm2, %v3611_v5  ;;  %v476_v0 = vld [vmem:[#allocation2 + $0x1d0] sm:$0xff]  ;;  %v477_v8 = vld [vmem:[#allocation2 + $0x1d8] sm:$0xff] }
  0x35   : > { %380 = vst.msk [vmem:[#allocation2 + $0x250] sm:$0xff] %vm305_vm2, %v3611_v5  ;;  %381 = vst.msk [vmem:[#allocation2 + $0x258] sm:$0xff] %vm305_vm2, %v3611_v5  ;;  %v424_v23 = vld [vmem:[#allocation2 + $0x30] sm:$0xff] }
  0x36   : > { %382 = vst.msk [vmem:[#allocation2 + $0x260] sm:$0xff] %vm305_vm2, %v3611_v5  ;;  %383 = vst.msk [vmem:[#allocation2 + $0x268] sm:$0xff] %vm305_vm2, %v3611_v5  ;;  %v480_v24 = vld [vmem:[#allocation2 + $0x1f0] sm:$0xff] }
  0x37   : > { %384 = vst.msk [vmem:[#allocation2 + $0x270] sm:$0xff] %vm305_vm2, %v3611_v5  ;;  %385 = vst.msk [vmem:[#allocation2 + $0x278] sm:$0xff] %vm305_vm2, %v3611_v5 }
  0x38   : > { %386 = vst.msk [vmem:[#allocation2 + $0x280] sm:$0xff] %vm305_vm2, %v3611_v5  ;;  %387 = vst.msk [vmem:[#allocation2 + $0x288] sm:$0xff] %vm305_vm2, %v3611_v5  ;;  %3399 = vmatmul.mubr.msk.bf16.gmra.mrb[16].mxu0 %vm937_vm3, %v3544_v25  ;;  %3455 = vmatmul.mubr.msk.bf16.gmra.mrb[16].mxu1 %vm937_vm3, %v3545_v26  ;;  %v422_v25 = vld [vmem:[#allocation2 + $0x20] sm:$0xff] }
  0x39   : > { %388 = vst.msk [vmem:[#allocation2 + $0x290] sm:$0xff] %vm305_vm2, %v3611_v5  ;;  %389 = vst.msk [vmem:[#allocation2 + $0x298] sm:$0xff] %vm305_vm2, %v3611_v5  ;;  %3402 = vmatprep.mubr.msk.bf16.mxu0 %vm937_vm3, %v3546_v27  ;;  %3458 = vmatprep.mubr.msk.bf16.mxu1 %vm937_vm3, %v3547_v28  ;;  %v4037_v26 = vld [vmem:[%s4827_s2] ss:$0 sm:$0xff] }
  0x3a   : > { %390 = vst.msk [vmem:[#allocation2 + $0x2a0] sm:$0xff] %vm305_vm2, %v3611_v5  ;;  %391 = vst.msk [vmem:[#allocation2 + $0x2a8] sm:$0xff] %vm305_vm2, %v3611_v5  ;;  %v478_v28 = vld [vmem:[#allocation2 + $0x1e0] sm:$0xff] }
  0x3b   : > { %392 = vst.msk [vmem:[#allocation2 + $0x2b0] sm:$0xff] %vm305_vm2, %v3611_v5  ;;  %393 = vst.msk [vmem:[#allocation2 + $0x2b8] sm:$0xff] %vm305_vm2, %v3611_v5 }
  0x3c   : > { %394 = vst.msk [vmem:[#allocation2 + $0x2c0] sm:$0xff] %vm305_vm2, %v3611_v5  ;;  %395 = vst.msk [vmem:[#allocation2 + $0x2c8] sm:$0xff] %vm305_vm2, %v3611_v5 }
  0x3d   : > { %396 = vst.msk [vmem:[#allocation2 + $0x2d0] sm:$0xff] %vm305_vm2, %v3611_v5  ;;  %397 = vst.msk [vmem:[#allocation2 + $0x2d8] sm:$0xff] %vm305_vm2, %v3611_v5 }
  0x3e   : > { %398 = vst.msk [vmem:[#allocation2 + $0x2e0] sm:$0xff] %vm305_vm2, %v3611_v5  ;;  %399 = vst.msk [vmem:[#allocation2 + $0x2e8] sm:$0xff] %vm305_vm2, %v3611_v5 }
  0x3f   : > { %400 = vst.msk [vmem:[#allocation2 + $0x2f0] sm:$0xff] %vm305_vm2, %v3611_v5  ;;  %401 = vst.msk [vmem:[#allocation2 + $0x2f8] sm:$0xff] %vm305_vm2, %v3611_v5 }
  0x40   : > { %402 = vst.msk [vmem:[#allocation2 + $0x300] sm:$0xff] %vm305_vm2, %v3611_v5  ;;  %403 = vst.msk [vmem:[#allocation2 + $0x308] sm:$0xff] %vm305_vm2, %v3611_v5  ;;  %3403 = vmatmul.mubr.msk.bf16.gmra.mrb[20].mxu0 %vm937_vm3, %v3548_v29  ;;  %3459 = vmatmul.mubr.msk.bf16.gmra.mrb[20].mxu1 %vm937_vm3, %v3549_v30  ;;  %v425_v29 = vld [vmem:[#allocation2 + $0x38] sm:$0xff] }
  0x41   : > { %404 = vst.msk [vmem:[#allocation2 + $0x310] sm:$0xff] %vm305_vm2, %v3611_v5  ;;  %405 = vst.msk [vmem:[#allocation2 + $0x318] sm:$0xff] %vm305_vm2, %v3611_v5  ;;  %3406 = vmatprep.mubr.msk.bf16.mxu0 %vm937_vm3, %v3550_v31  ;;  %3462 = vmatprep.mubr.msk.bf16.mxu1 %vm937_vm3, %v3551_v32 }
  0x42   : > { %406 = vst.msk [vmem:[#allocation2 + $0x320] sm:$0xff] %vm305_vm2, %v3611_v5  ;;  %407 = vst.msk [vmem:[#allocation2 + $0x328] sm:$0xff] %vm305_vm2, %v3611_v5 }
  0x43   : > { %408 = vst.msk [vmem:[#allocation2 + $0x330] sm:$0xff] %vm305_vm2, %v3611_v5  ;;  %409 = vst.msk [vmem:[#allocation2 + $0x338] sm:$0xff] %vm305_vm2, %v3611_v5 }
  0x44   : > { %410 = vst.msk [vmem:[#allocation2 + $0x340] sm:$0xff] %vm305_vm2, %v3611_v5  ;;  %411 = vst.msk [vmem:[#allocation2 + $0x348] sm:$0xff] %vm305_vm2, %v3611_v5 }
  0x45   : > { %412 = vst.msk [vmem:[#allocation2 + $0x350] sm:$0xff] %vm305_vm2, %v3611_v5  ;;  %413 = vst.msk [vmem:[#allocation2 + $0x358] sm:$0xff] %vm305_vm2, %v3611_v5 }
  0x46   : > { %414 = vst.msk [vmem:[#allocation2 + $0x360] sm:$0xff] %vm305_vm2, %v3611_v5  ;;  %415 = vst.msk [vmem:[#allocation2 + $0x368] sm:$0xff] %vm305_vm2, %v3611_v5 }
  0x47   : > { %416 = vst.msk [vmem:[#allocation2 + $0x370] sm:$0xff] %vm305_vm2, %v3611_v5  ;;  %417 = vst.msk [vmem:[#allocation2 + $0x378] sm:$0xff] %vm305_vm2, %v3611_v5 }
  0x48   : > { %3407 = vmatmul.mubr.msk.bf16.gmra.mrb[24].mxu0 %vm937_vm3, %v3552_v33  ;;  %3463 = vmatmul.mubr.msk.bf16.gmra.mrb[24].mxu1 %vm937_vm3, %v3553_v34  ;;  %v481_v33 = vld [vmem:[#allocation2 + $0x1f8] sm:$0xff]  ;;  %v423_v34 = vld [vmem:[#allocation2 + $0x28] sm:$0xff] }
  0x49   : > { %3410 = vmatprep.mubr.msk.bf16.mxu0 %vm937_vm3, %v3554_v35  ;;  %3466 = vmatprep.mubr.msk.bf16.mxu1 %vm937_vm3, %v3555_v36  ;;  %v4042_v36 = vld [vmem:[%s4828_s3] ss:$0 sm:$0xff] }
  0x50   : > { %3411 = vmatmul.mubr.msk.bf16.gmra.mrb[28].mxu0 %vm937_vm3, %v3556_v37  ;;  %3467 = vmatmul.mubr.msk.bf16.gmra.mrb[28].mxu1 %vm937_vm3, %v3557_v38 }
  0x51   : > { %3414 = vmatprep.mubr.msk.bf16.mxu0 %vm937_vm3, %v3558_v39  ;;  %3470 = vmatprep.mubr.msk.bf16.mxu1 %vm937_vm3, %v3559_v40 }
  0x58   : > { %3415 = vmatmul.mubr.msk.bf16.gmra.mrb[32].mxu0 %vm937_vm3, %v3560_v41  ;;  %3471 = vmatmul.mubr.msk.bf16.gmra.mrb[32].mxu1 %vm937_vm3, %v3561_v42  ;;  %v479_v41 = vld [vmem:[#allocation2 + $0x1e8] sm:$0xff] }
  0x59   : > { %3418 = vmatprep.mubr.msk.bf16.mxu0 %vm937_vm3, %v3562_v43  ;;  %3474 = vmatprep.mubr.msk.bf16.mxu1 %vm937_vm3, %v3563_v44 }
  0x60   : > { %3419 = vmatmul.mubr.msk.bf16.gmra.mrb[36].mxu0 %vm937_vm3, %v3564_v45  ;;  %3475 = vmatmul.mubr.msk.bf16.gmra.mrb[36].mxu1 %vm937_vm3, %v3565_v46 }
  0x61   : > { %3422 = vmatprep.mubr.msk.bf16.mxu0 %vm937_vm3, %v3566_v47  ;;  %3478 = vmatprep.mubr.msk.bf16.mxu1 %vm937_vm3, %v3567_v48 }
  0x68   : > { %3423 = vmatmul.mubr.msk.bf16.gmra.mrb[40].mxu0 %vm937_vm3, %v3568_v49  ;;  %3479 = vmatmul.mubr.msk.bf16.gmra.mrb[40].mxu1 %vm937_vm3, %v3569_v50 }
  0x69   : > { %3426 = vmatprep.mubr.msk.bf16.mxu0 %vm937_vm3, %v3570_v51  ;;  %3482 = vmatprep.mubr.msk.bf16.mxu1 %vm937_vm3, %v3571_v52 }
  0x70   : > { %3427 = vmatmul.mubr.msk.bf16.gmra.mrb[44].mxu0 %vm937_vm3, %v3572_v53  ;;  %3483 = vmatmul.mubr.msk.bf16.gmra.mrb[44].mxu1 %vm937_vm3, %v3573_v54 }
  0x71   : > { %3430 = vmatprep.mubr.msk.bf16.mxu0 %vm937_vm3, %v3574_v55  ;;  %3486 = vmatprep.mubr.msk.bf16.mxu1 %vm937_vm3, %v3575_v56 }
  0x78   : > { %3431 = vmatmul.mubr.msk.bf16.gmra.mrb[48].mxu0 %vm937_vm3, %v3576_v57  ;;  %3487 = vmatmul.mubr.msk.bf16.gmra.mrb[48].mxu1 %vm937_vm3, %v3577_v58 }
  0x79   : > { %3434 = vmatprep.mubr.msk.bf16.mxu0 %vm937_vm3, %v3578_v59  ;;  %3490 = vmatprep.mubr.msk.bf16.mxu1 %vm937_vm3, %v3579_v60 }
  0x80   : > { %3435 = vmatmul.mubr.msk.bf16.gmra.mrb[52].mxu0 %vm937_vm3, %v3580_v61  ;;  %3491 = vmatmul.mubr.msk.bf16.gmra.mrb[52].mxu1 %vm937_vm3, %v3581_v62 }
  0xeb   : > { %v3384_v2 = vpop.f32.mrb[0].mxu0  ;;  %v3440_v6 = vpop.f32.mrb[0].mxu1 }
  0xec   : > { %v1596_v5 = vadd.f32 %v3384_v2, %v420_v63  ;;  %v1147_v7 = vpop.f32.mrb[1].mxu0  ;;  %v1652_v10 = vadd.f32 %v3440_v6, %v476_v0  ;;  %v1371_v12 = vpop.f32.mrb[1].mxu1 }
  0xed   : > { %v1594_v11 = vadd.f32 %v1147_v7, %v418_v1  ;;  %v3385_v13 = vpop.f32.mrb[2].mxu0  ;;  %v1650_v15 = vadd.f32 %v1371_v12, %v474_v3  ;;  %v3441_v17 = vpop.f32.mrb[2].mxu1 }
  0xee   : > { %1709 = vst.msk [vmem:[#allocation2 + $0x10] sm:$0xff] %vm305_vm2, %v1596_v5  ;;  %v1597_v16 = vadd.f32 %v3385_v13, %v421_v4  ;;  %v1150_v18 = vpop.f32.mrb[3].mxu0  ;;  %1765 = vst.msk [vmem:[#allocation2 + $0x1d0] sm:$0xff] %vm305_vm2, %v1652_v10  ;;  %v1653_v19 = vadd.f32 %v3441_v17, %v477_v8  ;;  %v1374_v21 = vpop.f32.mrb[3].mxu1 }
  0xef   : > { %1707 = vst.msk [vmem:[#allocation2] sm:$0xff] %vm305_vm2, %v1594_v11  ;;  %v1595_v20 = vadd.f32 %v1150_v18, %v419_v9  ;;  %1763 = vst.msk [vmem:[#allocation2 + $0x1c0] sm:$0xff] %vm305_vm2, %v1650_v15  ;;  %v1651_v22 = vadd.f32 %v1374_v21, %v475_v14 }
  0xf0   : > { %1710 = vst.msk [vmem:[#allocation2 + $0x18] sm:$0xff] %vm305_vm2, %v1597_v16  ;;  %1766 = vst.msk [vmem:[#allocation2 + $0x1d8] sm:$0xff] %vm305_vm2, %v1653_v19 }
  0xf1   : > { %1708 = vst.msk [vmem:[#allocation2 + $0x8] sm:$0xff] %vm305_vm2, %v1595_v20  ;;  %1764 = vst.msk [vmem:[#allocation2 + $0x1c8] sm:$0xff] %vm305_vm2, %v1651_v22 }
  0xf3   : > { %v3388_v27 = vpop.f32.mrb[4].mxu0  ;;  %v3444_v31 = vpop.f32.mrb[4].mxu1 }
  0xf4   : > { %v1600_v30 = vadd.f32 %v3388_v27, %v424_v23  ;;  %v1163_v32 = vpop.f32.mrb[5].mxu0  ;;  %v1656_v37 = vadd.f32 %v3444_v31, %v480_v24  ;;  %v1387_v39 = vpop.f32.mrb[5].mxu1 }
  0xf5   : > { %v1824_v35 = vld [vmem:[#allocation2 + $0x10] sm:$0xff]  ;;  %v1598_v38 = vadd.f32 %v1163_v32, %v422_v25  ;;  %v3389_v40 = vpop.f32.mrb[6].mxu0  ;;  %v1654_v45 = vadd.f32 %v1387_v39, %v478_v28  ;;  %v3445_v47 = vpop.f32.mrb[6].mxu1 }
  0xf6   : > { %v1943_v42 = vmul.f32 %v4037_v26, %v1824_v35  ;;  %v1880_v43 = vld [vmem:[#allocation2 + $0x1d0] sm:$0xff]  ;;  %v1822_v44 = vld [vmem:[#allocation2] sm:$0xff]  ;;  %1713 = vst.msk [vmem:[#allocation2 + $0x30] sm:$0xff] %vm305_vm2, %v1600_v30  ;;  %v1601_v46 = vadd.f32 %v3389_v40, %v425_v29  ;;  %v1166_v48 = vpop.f32.mrb[7].mxu0  ;;  %1769 = vst.msk [vmem:[#allocation2 + $0x1f0] sm:$0xff] %vm305_vm2, %v1656_v37  ;;  %v1657_v53 = vadd.f32 %v3445_v47, %v481_v33  ;;  %v1390_v55 = vpop.f32.mrb[7].mxu1 }
  0xf7   : > { %v1999_v49 = vmul.f32 %v4037_v26, %v1880_v43  ;;  %v1941_v50 = vmul.f32 %v4037_v26, %v1822_v44  ;;  %v1878_v51 = vld [vmem:[#allocation2 + $0x1c0] sm:$0xff]  ;;  %v1825_v52 = vld [vmem:[#allocation2 + $0x18] sm:$0xff]  ;;  %1711 = vst.msk [vmem:[#allocation2 + $0x20] sm:$0xff] %vm305_vm2, %v1598_v38  ;;  %v1599_v54 = vadd.f32 %v1166_v48, %v423_v34  ;;  %1767 = vst.msk [vmem:[#allocation2 + $0x1e0] sm:$0xff] %vm305_vm2, %v1654_v45 }
  0xf8   : > { %v2062_v56 = vadd.f32 %v4042_v36, %v1943_v42  ;;  %v1997_v57 = vmul.f32 %v4037_v26, %v1878_v51  ;;  %v1944_v58 = vmul.f32 %v4037_v26, %v1825_v52  ;;  %v1881_v59 = vld [vmem:[#allocation2 + $0x1d8] sm:$0xff]  ;;  %v1823_v60 = vld [vmem:[#allocation2 + $0x8] sm:$0xff]  ;;  %1714 = vst.msk [vmem:[#allocation2 + $0x38] sm:$0xff] %vm305_vm2, %v1601_v46  ;;  %v1655_v61 = vadd.f32 %v1390_v55, %v479_v41 }
  0xf9   : > { %v2118_v62 = vadd.f32 %v4042_v36, %v1999_v49  ;;  %v2060_v63 = vadd.f32 %v4042_v36, %v1941_v50  ;;  %v2000_v0 = vmul.f32 %v4037_v26, %v1881_v59  ;;  %v1942_v1 = vmul.f32 %v4037_v26, %v1823_v60  ;;  %v1879_v2 = vld [vmem:[#allocation2 + $0x1c8] sm:$0xff]  ;;  %1770 = vst.msk [vmem:[#allocation2 + $0x1f8] sm:$0xff] %vm305_vm2, %v1657_v53 }
  0xfa   : > { %1712 = vst.msk [vmem:[#allocation2 + $0x28] sm:$0xff] %vm305_vm2, %v1599_v54  ;;  %v2174_v3 = vmax.f32 %v2062_v56, 0.0  ;;  %v2116_v4 = vadd.f32 %v4042_v36, %v1997_v57  ;;  %v2063_v5 = vadd.f32 %v4042_v36, %v1944_v58  ;;  %v1998_v6 = vmul.f32 %v4037_v26, %v1879_v2  ;;  %1768 = vst.msk [vmem:[#allocation2 + $0x1e8] sm:$0xff] %vm305_vm2, %v1655_v61  ;;  %v428_v57 = vld [vmem:[#allocation2 + $0x50] sm:$0xff] }
  0xfb   : > { %v2230_v7 = vmax.f32 %v2118_v62, 0.0  ;;  %v2172_v8 = vmax.f32 %v2060_v63, 0.0  ;;  %v2119_v9 = vadd.f32 %v4042_v36, %v2000_v0  ;;  %v2061_v10 = vadd.f32 %v4042_v36, %v1942_v1  ;;  %v4074_v11 = vpop.f32.mrb[8].mxu0  ;;  %v4077_v16 = vpop.f32.mrb[8].mxu1  ;;  %v484_v62 = vld [vmem:[#allocation2 + $0x210] sm:$0xff]  ;;  %v426_v63 = vld [vmem:[#allocation2 + $0x40] sm:$0xff] }
  0xfc   : > { %v3210_v12 = vpack.c.bf16 %v2174_v3, %v2174_v3  ;;  %v2228_v13 = vmax.f32 %v2116_v4, 0.0  ;;  %v2175_v14 = vmax.f32 %v2063_v5, 0.0  ;;  %v2117_v15 = vadd.f32 %v4042_v36, %v1998_v6  ;;  %v4079_v17 = vpop.f32.mrb[9].mxu0  ;;  %v4081_v23 = vpop.f32.mrb[9].mxu1  ;;  %v482_v0 = vld [vmem:[#allocation2 + $0x200] sm:$0xff]  ;;  %v429_v6 = vld [vmem:[#allocation2 + $0x58] sm:$0xff] }
  0xfd   : > { %v3266_v18 = vpack.c.bf16 %v2230_v7, %v2230_v7  ;;  %v3208_v19 = vpack.c.bf16 %v2172_v8, %v2172_v8  ;;  %v2231_v20 = vmax.f32 %v2119_v9, 0.0  ;;  %v2173_v21 = vmax.f32 %v2061_v10, 0.0  ;;  %v1828_v22 = vld [vmem:[#allocation2 + $0x30] sm:$0xff]  ;;  %v4083_v24 = vpop.f32.mrb[10].mxu0  ;;  %v4088_v32 = vpop.f32.mrb[10].mxu1  ;;  %v485_v7 = vld [vmem:[#allocation2 + $0x218] sm:$0xff] }
  0xfe   : > { %2735 = vst.msk [vmem:[%s4070_s9 + $0x8] sm:$0xf] %vm2732_vm4, %v3210_v12  ;;  %v3264_v25 = vpack.c.bf16 %v2228_v13, %v2228_v13  ;;  %v3211_v27 = vpack.c.bf16 %v2175_v14, %v2175_v14  ;;  %v2229_v28 = vmax.f32 %v2117_v15, 0.0  ;;  %v1947_v29 = vmul.f32 %v4037_v26, %v1828_v22  ;;  %v1884_v30 = vld [vmem:[#allocation2 + $0x1f0] sm:$0xff]  ;;  %v1826_v31 = vld [vmem:[#allocation2 + $0x20] sm:$0xff]  ;;  %v4090_v33 = vpop.f32.mrb[11].mxu0 }
  0xff   : > { %2791 = vst.msk [vmem:[%s4070_s9 + $0xe8] sm:$0xf] %vm2732_vm4, %v3266_v18  ;;  %2733 = vst.msk [vmem:[%s4070_s9] sm:$0xf] %vm2732_vm4, %v3208_v19  ;;  %v3267_v34 = vpack.c.bf16 %v2231_v20, %v2231_v20  ;;  %v3209_v35 = vpack.c.bf16 %v2173_v21, %v2173_v21  ;;  %v2003_v37 = vmul.f32 %v4037_v26, %v1884_v30  ;;  %v1882_v39 = vld [vmem:[#allocation2 + $0x1e0] sm:$0xff]  ;;  %v1829_v40 = vld [vmem:[#allocation2 + $0x38] sm:$0xff] }
 0x100   : > { %v1945_v38 = vmul.f32 %v4037_v26, %v1826_v31  ;;  %v4098_v41 = vpop.f32.mrb[11].mxu1  ;;  %2789 = vst.msk [vmem:[%s4070_s9 + $0xe0] sm:$0xf] %vm2732_vm4, %v3264_v25  ;;  %2736 = vst.msk [vmem:[%s4070_s9 + $0xc] sm:$0xf] %vm2732_vm4, %v3211_v27  ;;  %v3265_v42 = vpack.c.bf16 %v2229_v28, %v2229_v28  ;;  %v2066_v43 = vadd.f32 %v4042_v36, %v1947_v29  ;;  %v1885_v46 = vld [vmem:[#allocation2 + $0x1f8] sm:$0xff] }
 0x101   : > { %v2001_v44 = vmul.f32 %v4037_v26, %v1882_v39  ;;  %v1948_v45 = vmul.f32 %v4037_v26, %v1829_v40  ;;  %v1827_v47 = vld [vmem:[#allocation2 + $0x28] sm:$0xff]  ;;  %2792 = vst.msk [vmem:[%s4070_s9 + $0xec] sm:$0xf] %vm2732_vm4, %v3267_v34  ;;  %2734 = vst.msk [vmem:[%s4070_s9 + $0x4] sm:$0xf] %vm2732_vm4, %v3209_v35  ;;  %v2122_v48 = vadd.f32 %v4042_v36, %v2003_v37  ;;  %v432_v28 = vld [vmem:[#allocation2 + $0x70] sm:$0xff] }
 0x102   : > { %v2064_v49 = vadd.f32 %v4042_v36, %v1945_v38  ;;  %v2004_v50 = vmul.f32 %v4037_v26, %v1885_v46  ;;  %v1946_v51 = vmul.f32 %v4037_v26, %v1827_v47  ;;  %v1883_v52 = vld [vmem:[#allocation2 + $0x1e8] sm:$0xff]  ;;  %2790 = vst.msk [vmem:[%s4070_s9 + $0xe4] sm:$0xf] %vm2732_vm4, %v3265_v42  ;;  %v2178_v53 = vmax.f32 %v2066_v43, 0.0  ;;  %v488_v29 = vld [vmem:[#allocation2 + $0x230] sm:$0xff]  ;;  %v430_v30 = vld [vmem:[#allocation2 + $0x60] sm:$0xff] }
 0x103   : > { %v2120_v54 = vadd.f32 %v4042_v36, %v2001_v44  ;;  %v2067_v55 = vadd.f32 %v4042_v36, %v1948_v45  ;;  %v2002_v56 = vmul.f32 %v4037_v26, %v1883_v52  ;;  %v2234_v58 = vmax.f32 %v2122_v48, 0.0  ;;  %v3396_v1 = vpop.f32.mrb[12].mxu0  ;;  %v3452_v8 = vpop.f32.mrb[12].mxu1  ;;  %v427_v15 = vld [vmem:[#allocation2 + $0x48] sm:$0xff]  ;;  %v433_v40 = vld [vmem:[#allocation2 + $0x78] sm:$0xff] }
 0x104   : > { %v2176_v59 = vmax.f32 %v2064_v49, 0.0  ;;  %v2123_v60 = vadd.f32 %v4042_v36, %v2004_v50  ;;  %v2065_v61 = vadd.f32 %v4042_v36, %v1946_v51  ;;  %v3214_v2 = vpack.c.bf16 %v2178_v53, %v2178_v53  ;;  %v1195_v9 = vpop.f32.mrb[13].mxu0  ;;  %v483_v18 = vld [vmem:[#allocation2 + $0x208] sm:$0xff]  ;;  %v1419_v19 = vpop.f32.mrb[13].mxu1  ;;  %v489_v42 = vld [vmem:[#allocation2 + $0x238] sm:$0xff]  ;;  %v436_v51 = vld [vmem:[#allocation2 + $0x90] sm:$0xff] }
 0x105   : > { %v2232_v3 = vmax.f32 %v2120_v54, 0.0  ;;  %v2179_v4 = vmax.f32 %v2067_v55, 0.0  ;;  %v2121_v5 = vadd.f32 %v4042_v36, %v2002_v56  ;;  %v3270_v10 = vpack.c.bf16 %v2234_v58, %v2234_v58  ;;  %v3397_v20 = vpop.f32.mrb[14].mxu0  ;;  %v3453_v31 = vpop.f32.mrb[14].mxu1  ;;  %v431_v47 = vld [vmem:[#allocation2 + $0x68] sm:$0xff]  ;;  %v492_v54 = vld [vmem:[#allocation2 + $0x250] sm:$0xff] }
 0x106   : > { %v3212_v12 = vpack.c.bf16 %v2176_v59, %v2176_v59  ;;  %v2235_v13 = vmax.f32 %v2123_v60, 0.0  ;;  %v2177_v14 = vmax.f32 %v2065_v61, 0.0  ;;  %2739 = vst.msk [vmem:[%s4070_s9 + $0x18] sm:$0xf] %vm2732_vm4, %v3214_v2  ;;  %v1604_v27 = vadd.f32 %v4074_v11, %v428_v57  ;;  %v1198_v34 = vpop.f32.mrb[15].mxu0  ;;  %v486_v11 = vld [vmem:[#allocation2 + $0x220] sm:$0xff] }
 0x107   : > { %v3268_v21 = vpack.c.bf16 %v2232_v3, %v2232_v3  ;;  %v3215_v22 = vpack.c.bf16 %v2179_v4, %v2179_v4  ;;  %v2233_v25 = vmax.f32 %v2121_v5, 0.0  ;;  %2795 = vst.msk [vmem:[%s4070_s9 + $0xf8] sm:$0xf] %vm2732_vm4, %v3270_v10  ;;  %v1660_v38 = vadd.f32 %v4077_v16, %v484_v62  ;;  %v1422_v43 = vpop.f32.mrb[15].mxu1  ;;  %v434_v55 = vld [vmem:[#allocation2 + $0x80] sm:$0xff]  ;;  %v437_v58 = vld [vmem:[#allocation2 + $0x98] sm:$0xff] }
 0x108   : > { %2737 = vst.msk [vmem:[%s4070_s9 + $0x10] sm:$0xf] %vm2732_vm4, %v3212_v12  ;;  %v3271_v35 = vpack.c.bf16 %v2235_v13, %v2235_v13  ;;  %v3213_v37 = vpack.c.bf16 %v2177_v14, %v2177_v14  ;;  %v1602_v39 = vadd.f32 %v4079_v17, %v426_v63  ;;  %v1658_v45 = vadd.f32 %v4081_v23, %v482_v0  ;;  %v487_v17 = vld [vmem:[#allocation2 + $0x228] sm:$0xff]  ;;  %v490_v57 = vld [vmem:[#allocation2 + $0x240] sm:$0xff]  ;;  %v493_v62 = vld [vmem:[#allocation2 + $0x258] sm:$0xff] }
 0x109   : > { %2793 = vst.msk [vmem:[%s4070_s9 + $0xf0] sm:$0xf] %vm2732_vm4, %v3268_v21  ;;  %2740 = vst.msk [vmem:[%s4070_s9 + $0x1c] sm:$0xf] %vm2732_vm4, %v3215_v22  ;;  %v3269_v44 = vpack.c.bf16 %v2233_v25, %v2233_v25  ;;  %v1605_v46 = vadd.f32 %v4083_v24, %v429_v6  ;;  %v1661_v16 = vadd.f32 %v4088_v32, %v485_v7  ;;  %v435_v63 = vld [vmem:[#allocation2 + $0x88] sm:$0xff] }
 0x10a   : > { %1717 = vst.msk [vmem:[#allocation2 + $0x50] sm:$0xff] %vm305_vm2, %v1604_v27  ;;  %1773 = vst.msk [vmem:[#allocation2 + $0x210] sm:$0xff] %vm305_vm2, %v1660_v38  ;;  %v1603_v48 = vadd.f32 %v4090_v33, %v427_v15  ;;  %v1659_v49 = vadd.f32 %v4098_v41, %v483_v18  ;;  %v1608_v50 = vadd.f32 %v3396_v1, %v432_v28  ;;  %v491_v4 = vld [vmem:[#allocation2 + $0x248] sm:$0xff] }
 0x10b   : > { %2796 = vst.msk [vmem:[%s4070_s9 + $0xfc] sm:$0xf] %vm2732_vm4, %v3271_v35  ;;  %2738 = vst.msk [vmem:[%s4070_s9 + $0x14] sm:$0xf] %vm2732_vm4, %v3213_v37  ;;  %v1664_v23 = vadd.f32 %v3452_v8, %v488_v29  ;;  %v1606_v24 = vadd.f32 %v1195_v9, %v430_v30  ;;  %v1662_v32 = vadd.f32 %v1419_v19, %v486_v11  ;;  %v3400_v56 = vpop.f32.mrb[16].mxu0  ;;  %v3456_v60 = vpop.f32.mrb[16].mxu1 }
 0x10c   : > { %1715 = vst.msk [vmem:[#allocation2 + $0x40] sm:$0xff] %vm305_vm2, %v1602_v39  ;;  %1771 = vst.msk [vmem:[#allocation2 + $0x200] sm:$0xff] %vm305_vm2, %v1658_v45  ;;  %v1609_v52 = vadd.f32 %v3397_v20, %v433_v40  ;;  %v1665_v53 = vadd.f32 %v3453_v31, %v489_v42  ;;  %v1607_v33 = vadd.f32 %v1198_v34, %v431_v47  ;;  %v1211_v61 = vpop.f32.mrb[17].mxu0  ;;  %v1435_v2 = vpop.f32.mrb[17].mxu1 }
 0x10d   : > { %2794 = vst.msk [vmem:[%s4070_s9 + $0xf4] sm:$0xf] %vm2732_vm4, %v3269_v44  ;;  %v1663_v41 = vadd.f32 %v1422_v43, %v487_v17  ;;  %v1612_v59 = vadd.f32 %v3400_v56, %v436_v51  ;;  %v1668_v0 = vadd.f32 %v3456_v60, %v492_v54  ;;  %v1610_v1 = vadd.f32 %v1211_v61, %v434_v55  ;;  %v3401_v3 = vpop.f32.mrb[18].mxu0  ;;  %v3457_v7 = vpop.f32.mrb[18].mxu1 }
 0x10e   : > { %1718 = vst.msk [vmem:[#allocation2 + $0x58] sm:$0xff] %vm305_vm2, %v1605_v46  ;;  %1774 = vst.msk [vmem:[#allocation2 + $0x218] sm:$0xff] %vm305_vm2, %v1661_v16  ;;  %v1666_v5 = vadd.f32 %v1435_v2, %v490_v57  ;;  %v1613_v6 = vadd.f32 %v3401_v3, %v437_v58  ;;  %v1214_v8 = vpop.f32.mrb[19].mxu0  ;;  %v1669_v10 = vadd.f32 %v3457_v7, %v493_v62  ;;  %v1438_v13 = vpop.f32.mrb[19].mxu1 }
 0x10f   : > { %1716 = vst.msk [vmem:[#allocation2 + $0x48] sm:$0xff] %vm305_vm2, %v1603_v48  ;;  %1772 = vst.msk [vmem:[#allocation2 + $0x208] sm:$0xff] %vm305_vm2, %v1659_v49  ;;  %v1611_v12 = vadd.f32 %v1214_v8, %v435_v63  ;;  %v1667_v19 = vadd.f32 %v1438_v13, %v491_v4 }
 0x110   : > { %1721 = vst.msk [vmem:[#allocation2 + $0x70] sm:$0xff] %vm305_vm2, %v1608_v50  ;;  %1777 = vst.msk [vmem:[#allocation2 + $0x230] sm:$0xff] %vm305_vm2, %v1664_v23 }
 0x111   : > { %1719 = vst.msk [vmem:[#allocation2 + $0x60] sm:$0xff] %vm305_vm2, %v1606_v24  ;;  %1775 = vst.msk [vmem:[#allocation2 + $0x220] sm:$0xff] %vm305_vm2, %v1662_v32  ;;  %v1832_v9 = vld [vmem:[#allocation2 + $0x50] sm:$0xff] }
 0x112   : > { %1722 = vst.msk [vmem:[#allocation2 + $0x78] sm:$0xff] %vm305_vm2, %v1609_v52  ;;  %1778 = vst.msk [vmem:[#allocation2 + $0x238] sm:$0xff] %vm305_vm2, %v1665_v53  ;;  %v1951_v14 = vmul.f32 %v4037_v26, %v1832_v9  ;;  %v1888_v15 = vld [vmem:[#allocation2 + $0x210] sm:$0xff] }
 0x113   : > { %1720 = vst.msk [vmem:[#allocation2 + $0x68] sm:$0xff] %vm305_vm2, %v1607_v33  ;;  %1776 = vst.msk [vmem:[#allocation2 + $0x228] sm:$0xff] %vm305_vm2, %v1663_v41  ;;  %v1830_v18 = vld [vmem:[#allocation2 + $0x40] sm:$0xff]  ;;  %v2007_v20 = vmul.f32 %v4037_v26, %v1888_v15  ;;  %v4182_v40 = vpop.f32.mrb[20].mxu0  ;;  %v4187_v46 = vpop.f32.mrb[20].mxu1 }
 0x114   : > { %1725 = vst.msk [vmem:[#allocation2 + $0x90] sm:$0xff] %vm305_vm2, %v1612_v59  ;;  %1781 = vst.msk [vmem:[#allocation2 + $0x250] sm:$0xff] %vm305_vm2, %v1668_v0  ;;  %v1949_v21 = vmul.f32 %v4037_v26, %v1830_v18  ;;  %v1886_v22 = vld [vmem:[#allocation2 + $0x200] sm:$0xff]  ;;  %v2070_v28 = vadd.f32 %v4042_v36, %v1951_v14  ;;  %v4189_v16 = vpop.f32.mrb[21].mxu0  ;;  %v4193_v51 = vpop.f32.mrb[21].mxu1 }
 0x115   : > { %1723 = vst.msk [vmem:[#allocation2 + $0x80] sm:$0xff] %vm305_vm2, %v1610_v1  ;;  %1779 = vst.msk [vmem:[#allocation2 + $0x240] sm:$0xff] %vm305_vm2, %v1666_v5  ;;  %v1833_v25 = vld [vmem:[#allocation2 + $0x58] sm:$0xff]  ;;  %v2005_v29 = vmul.f32 %v4037_v26, %v1886_v22  ;;  %v2126_v37 = vadd.f32 %v4042_v36, %v2007_v20  ;;  %v4195_v24 = vpop.f32.mrb[22].mxu0  ;;  %v4197_v41 = vpop.f32.mrb[22].mxu1 }
 0x116   : > { %1726 = vst.msk [vmem:[#allocation2 + $0x98] sm:$0xff] %vm305_vm2, %v1613_v6  ;;  %v1889_v27 = vld [vmem:[#allocation2 + $0x218] sm:$0xff]  ;;  %1782 = vst.msk [vmem:[#allocation2 + $0x258] sm:$0xff] %vm305_vm2, %v1669_v10  ;;  %v1952_v30 = vmul.f32 %v4037_v26, %v1833_v25  ;;  %v1831_v34 = vld [vmem:[#allocation2 + $0x48] sm:$0xff]  ;;  %v2068_v38 = vadd.f32 %v4042_v36, %v1949_v21  ;;  %v2182_v42 = vmax.f32 %v2070_v28, 0.0  ;;  %v4199_v62 = vpop.f32.mrb[23].mxu0 }
 0x117   : > { %1724 = vst.msk [vmem:[#allocation2 + $0x88] sm:$0xff] %vm305_vm2, %v1611_v12  ;;  %v2008_v31 = vmul.f32 %v4037_v26, %v1889_v27  ;;  %v1887_v35 = vld [vmem:[#allocation2 + $0x208] sm:$0xff]  ;;  %1780 = vst.msk [vmem:[#allocation2 + $0x248] sm:$0xff] %vm305_vm2, %v1667_v19  ;;  %v1950_v39 = vmul.f32 %v4037_v26, %v1831_v34  ;;  %v2124_v43 = vadd.f32 %v4042_v36, %v2005_v29  ;;  %v2238_v47 = vmax.f32 %v2126_v37, 0.0  ;;  %v1836_v50 = vld [vmem:[#allocation2 + $0x70] sm:$0xff]  ;;  %v4201_v63 = vpop.f32.mrb[23].mxu1 }
 0x118   : > { %v2006_v11 = vmul.f32 %v4037_v26, %v1887_v35  ;;  %v2071_v44 = vadd.f32 %v4042_v36, %v1952_v30  ;;  %v2180_v17 = vmax.f32 %v2068_v38, 0.0  ;;  %v1892_v23 = vld [vmem:[#allocation2 + $0x230] sm:$0xff]  ;;  %v3218_v32 = vpack.c.bf16 %v2182_v42, %v2182_v42  ;;  %v1834_v55 = vld [vmem:[#allocation2 + $0x60] sm:$0xff] }
 0x119   : > { %v2127_v45 = vadd.f32 %v4042_v36, %v2008_v31  ;;  %v2069_v48 = vadd.f32 %v4042_v36, %v1950_v39  ;;  %v2236_v52 = vmax.f32 %v2124_v43, 0.0  ;;  %v1890_v33 = vld [vmem:[#allocation2 + $0x220] sm:$0xff]  ;;  %v3274_v56 = vpack.c.bf16 %v2238_v47, %v2238_v47  ;;  %v1837_v60 = vld [vmem:[#allocation2 + $0x78] sm:$0xff] }
 0x11a   : > { %v2125_v49 = vadd.f32 %v4042_v36, %v2006_v11  ;;  %v2183_v53 = vmax.f32 %v2071_v44, 0.0  ;;  %v3216_v57 = vpack.c.bf16 %v2180_v17, %v2180_v17  ;;  %v1893_v61 = vld [vmem:[#allocation2 + $0x238] sm:$0xff]  ;;  %2743 = vst.msk [vmem:[%s4070_s9 + $0x28] sm:$0xf] %vm2732_vm4, %v3218_v32  ;;  %v1955_v3 = vmul.f32 %v4037_v26, %v1836_v50  ;;  %v1835_v4 = vld [vmem:[#allocation2 + $0x68] sm:$0xff] }
 0x11b   : > { %v2239_v54 = vmax.f32 %v2127_v45, 0.0  ;;  %v2181_v58 = vmax.f32 %v2069_v48, 0.0  ;;  %v3272_v0 = vpack.c.bf16 %v2236_v52, %v2236_v52  ;;  %v1891_v5 = vld [vmem:[#allocation2 + $0x228] sm:$0xff]  ;;  %2799 = vst.msk [vmem:[%s4070_s9 + $0x108] sm:$0xf] %vm2732_vm4, %v3274_v56  ;;  %v2011_v8 = vmul.f32 %v4037_v26, %v1892_v23  ;;  %v4230_v21 = vpop.f32.mrb[24].mxu0 }
 0x11c   : > { %v2237_v59 = vmax.f32 %v2125_v49, 0.0  ;;  %v3219_v1 = vpack.c.bf16 %v2183_v53, %v2183_v53  ;;  %2741 = vst.msk [vmem:[%s4070_s9 + $0x20] sm:$0xf] %vm2732_vm4, %v3216_v57  ;;  %v1953_v9 = vmul.f32 %v4037_v26, %v1834_v55  ;;  %v2074_v10 = vadd.f32 %v4042_v36, %v1955_v3  ;;  %v4235_v29 = vpop.f32.mrb[24].mxu1  ;;  %v4237_v30 = vpop.f32.mrb[25].mxu0  ;;  %v1840_v38 = vld [vmem:[#allocation2 + $0x90] sm:$0xff] }
 0x11d   : > { %v3275_v2 = vpack.c.bf16 %v2239_v54, %v2239_v54  ;;  %v3217_v6 = vpack.c.bf16 %v2181_v58, %v2181_v58  ;;  %2797 = vst.msk [vmem:[%s4070_s9 + $0x100] sm:$0xf] %vm2732_vm4, %v3272_v0  ;;  %v2009_v12 = vmul.f32 %v4037_v26, %v1890_v33  ;;  %v1956_v13 = vmul.f32 %v4037_v26, %v1837_v60  ;;  %v1896_v39 = vld [vmem:[#allocation2 + $0x250] sm:$0xff]  ;;  %v4241_v11 = vpop.f32.mrb[25].mxu1  ;;  %v4243_v42 = vpop.f32.mrb[26].mxu0  ;;  %v1838_v17 = vld [vmem:[#allocation2 + $0x80] sm:$0xff] }
 0x11e   : > { %v3273_v7 = vpack.c.bf16 %v2237_v59, %v2237_v59  ;;  %2744 = vst.msk [vmem:[%s4070_s9 + $0x2c] sm:$0xf] %vm2732_vm4, %v3219_v1  ;;  %v2012_v14 = vmul.f32 %v4037_v26, %v1893_v61  ;;  %v2130_v15 = vadd.f32 %v4042_v36, %v2011_v8  ;;  %v2072_v18 = vadd.f32 %v4042_v36, %v1953_v9  ;;  %v4245_v48 = vpop.f32.mrb[26].mxu1  ;;  %v4247_v49 = vpop.f32.mrb[27].mxu0  ;;  %v1894_v53 = vld [vmem:[#allocation2 + $0x240] sm:$0xff]  ;;  %v1841_v54 = vld [vmem:[#allocation2 + $0x98] sm:$0xff] }
 0x11f   : > { %2800 = vst.msk [vmem:[%s4070_s9 + $0x10c] sm:$0xf] %vm2732_vm4, %v3275_v2  ;;  %2742 = vst.msk [vmem:[%s4070_s9 + $0x24] sm:$0xf] %vm2732_vm4, %v3217_v6  ;;  %v1954_v19 = vmul.f32 %v4037_v26, %v1835_v4  ;;  %v2010_v20 = vmul.f32 %v4037_v26, %v1891_v5  ;;  %v2186_v22 = vmax.f32 %v2074_v10, 0.0  ;;  %v2128_v25 = vadd.f32 %v4042_v36, %v2009_v12  ;;  %v1897_v55 = vld [vmem:[#allocation2 + $0x258] sm:$0xff] }
 0x120   : > { %2798 = vst.msk [vmem:[%s4070_s9 + $0x104] sm:$0xf] %vm2732_vm4, %v3273_v7  ;;  %v2075_v27 = vadd.f32 %v4042_v36, %v1956_v13  ;;  %v2131_v28 = vadd.f32 %v4042_v36, %v2012_v14  ;;  %v2242_v31 = vmax.f32 %v2130_v15, 0.0  ;;  %v2184_v34 = vmax.f32 %v2072_v18, 0.0  ;;  %v4249_v33 = vpop.f32.mrb[27].mxu1  ;;  %v1839_v60 = vld [vmem:[#allocation2 + $0x88] sm:$0xff] }
 0x121   : > { %v2073_v35 = vadd.f32 %v4042_v36, %v1954_v19  ;;  %v2129_v37 = vadd.f32 %v4042_v36, %v2010_v20  ;;  %v3222_v43 = vpack.c.bf16 %v2186_v22, %v2186_v22  ;;  %v2240_v44 = vmax.f32 %v2128_v25, 0.0  ;;  %v1895_v61 = vld [vmem:[#allocation2 + $0x248] sm:$0xff]  ;;  %v440_v20 = vld [vmem:[#allocation2 + $0xb0] sm:$0xff]  ;;  %v438_v25 = vld [vmem:[#allocation2 + $0xa0] sm:$0xff] }
 0x122   : > { %v2187_v45 = vmax.f32 %v2075_v27, 0.0  ;;  %v2243_v47 = vmax.f32 %v2131_v28, 0.0  ;;  %v3278_v50 = vpack.c.bf16 %v2242_v31, %v2242_v31  ;;  %v3220_v23 = vpack.c.bf16 %v2184_v34, %v2184_v34  ;;  %v496_v22 = vld [vmem:[#allocation2 + $0x270] sm:$0xff] }
 0x123   : > { %v2185_v32 = vmax.f32 %v2073_v35, 0.0  ;;  %v2241_v52 = vmax.f32 %v2129_v37, 0.0  ;;  %2747 = vst.msk [vmem:[%s4070_s9 + $0x38] sm:$0xf] %vm2732_vm4, %v3222_v43  ;;  %v3276_v56 = vpack.c.bf16 %v2240_v44, %v2240_v44  ;;  %v1959_v59 = vmul.f32 %v4037_v26, %v1840_v38  ;;  %v4278_v13 = vpop.f32.mrb[28].mxu0  ;;  %v4283_v27 = vpop.f32.mrb[28].mxu1 }
 0x124   : > { %v3223_v57 = vpack.c.bf16 %v2187_v45, %v2187_v45  ;;  %v3279_v58 = vpack.c.bf16 %v2243_v47, %v2243_v47  ;;  %2803 = vst.msk [vmem:[%s4070_s9 + $0x118] sm:$0xf] %vm2732_vm4, %v3278_v50  ;;  %2745 = vst.msk [vmem:[%s4070_s9 + $0x30] sm:$0xf] %vm2732_vm4, %v3220_v23  ;;  %v2015_v2 = vmul.f32 %v4037_v26, %v1896_v39  ;;  %v4285_v28 = vpop.f32.mrb[29].mxu0  ;;  %v494_v38 = vld [vmem:[#allocation2 + $0x260] sm:$0xff] }
 0x125   : > { %v3221_v0 = vpack.c.bf16 %v2185_v32, %v2185_v32  ;;  %v3277_v1 = vpack.c.bf16 %v2241_v52, %v2241_v52  ;;  %v1957_v3 = vmul.f32 %v4037_v26, %v1838_v17  ;;  %2801 = vst.msk [vmem:[%s4070_s9 + $0x110] sm:$0xf] %vm2732_vm4, %v3276_v56  ;;  %v2078_v4 = vadd.f32 %v4042_v36, %v1959_v59  ;;  %v441_v39 = vld [vmem:[#allocation2 + $0xb8] sm:$0xff]  ;;  %v439_v44 = vld [vmem:[#allocation2 + $0xa8] sm:$0xff]  ;;  %v4289_v45 = vpop.f32.mrb[29].mxu1  ;;  %v4291_v47 = vpop.f32.mrb[30].mxu0 }
 0x126   : > { %2748 = vst.msk [vmem:[%s4070_s9 + $0x3c] sm:$0xf] %vm2732_vm4, %v3223_v57  ;;  %2804 = vst.msk [vmem:[%s4070_s9 + $0x11c] sm:$0xf] %vm2732_vm4, %v3279_v58  ;;  %v2013_v5 = vmul.f32 %v4037_v26, %v1894_v53  ;;  %v1960_v6 = vmul.f32 %v4037_v26, %v1841_v54  ;;  %v2016_v7 = vmul.f32 %v4037_v26, %v1897_v55  ;;  %v497_v43 = vld [vmem:[#allocation2 + $0x278] sm:$0xff]  ;;  %v495_v52 = vld [vmem:[#allocation2 + $0x268] sm:$0xff] }
 0x127   : > { %2746 = vst.msk [vmem:[%s4070_s9 + $0x34] sm:$0xf] %vm2732_vm4, %v3221_v0  ;;  %2802 = vst.msk [vmem:[%s4070_s9 + $0x114] sm:$0xf] %vm2732_vm4, %v3277_v1  ;;  %v2134_v8 = vadd.f32 %v4042_v36, %v2015_v2  ;;  %v2076_v9 = vadd.f32 %v4042_v36, %v1957_v3  ;;  %v1958_v10 = vmul.f32 %v4037_v26, %v1839_v60  ;;  %v2190_v14 = vmax.f32 %v2078_v4, 0.0  ;;  %v444_v53 = vld [vmem:[#allocation2 + $0xd0] sm:$0xff] }
 0x128   : > { %v2014_v12 = vmul.f32 %v4037_v26, %v1895_v61  ;;  %v2132_v15 = vadd.f32 %v4042_v36, %v2013_v5  ;;  %v2079_v18 = vadd.f32 %v4042_v36, %v1960_v6  ;;  %v2135_v19 = vadd.f32 %v4042_v36, %v2016_v7  ;;  %v500_v54 = vld [vmem:[#allocation2 + $0x290] sm:$0xff]  ;;  %v4293_v55 = vpop.f32.mrb[30].mxu1  ;;  %v4295_v56 = vpop.f32.mrb[31].mxu0  ;;  %v442_v61 = vld [vmem:[#allocation2 + $0xc0] sm:$0xff]  ;;  %v445_v1 = vld [vmem:[#allocation2 + $0xd8] sm:$0xff] }
 0x129   : > { %v2246_v31 = vmax.f32 %v2134_v8, 0.0  ;;  %v2188_v34 = vmax.f32 %v2076_v9, 0.0  ;;  %v2077_v35 = vadd.f32 %v4042_v36, %v1958_v10  ;;  %v3226_v17 = vpack.c.bf16 %v2190_v14, %v2190_v14  ;;  %v498_v0 = vld [vmem:[#allocation2 + $0x280] sm:$0xff]  ;;  %v4297_v2 = vpop.f32.mrb[31].mxu1  ;;  %v501_v7 = vld [vmem:[#allocation2 + $0x298] sm:$0xff]  ;;  %v443_v8 = vld [vmem:[#allocation2 + $0xc8] sm:$0xff] }
 0x12a   : > { %v2133_v37 = vadd.f32 %v4042_v36, %v2014_v12  ;;  %v2244_v50 = vmax.f32 %v2132_v15, 0.0  ;;  %v2191_v23 = vmax.f32 %v2079_v18, 0.0  ;;  %v2247_v32 = vmax.f32 %v2135_v19, 0.0  ;;  %v499_v9 = vld [vmem:[#allocation2 + $0x288] sm:$0xff]  ;;  %v448_v18 = vld [vmem:[#allocation2 + $0xf0] sm:$0xff] }
 0x12b   : > { %v3282_v57 = vpack.c.bf16 %v2246_v31, %v2246_v31  ;;  %v3224_v58 = vpack.c.bf16 %v2188_v34, %v2188_v34  ;;  %v2189_v59 = vmax.f32 %v2077_v35, 0.0  ;;  %2751 = vst.msk [vmem:[%s4070_s9 + $0x48] sm:$0xf] %vm2732_vm4, %v3226_v17  ;;  %v1616_v6 = vadd.f32 %v4182_v40, %v440_v20  ;;  %v504_v19 = vld [vmem:[#allocation2 + $0x2b0] sm:$0xff]  ;;  %v446_v31 = vld [vmem:[#allocation2 + $0xe0] sm:$0xff]  ;;  %v505_v34 = vld [vmem:[#allocation2 + $0x2b8] sm:$0xff] }
 0x12c   : > { %v2245_v60 = vmax.f32 %v2133_v37, 0.0  ;;  %v3280_v3 = vpack.c.bf16 %v2244_v50, %v2244_v50  ;;  %v3227_v4 = vpack.c.bf16 %v2191_v23, %v2191_v23  ;;  %v3283_v5 = vpack.c.bf16 %v2247_v32, %v2247_v32  ;;  %v503_v37 = vld [vmem:[#allocation2 + $0x2a8] sm:$0xff]  ;;  %v450_v17 = vld [vmem:[#allocation2 + $0x100] sm:$0xff] }
 0x12d   : > { %2807 = vst.msk [vmem:[%s4070_s9 + $0x128] sm:$0xf] %vm2732_vm4, %v3282_v57  ;;  %2749 = vst.msk [vmem:[%s4070_s9 + $0x40] sm:$0xf] %vm2732_vm4, %v3224_v58  ;;  %v3225_v10 = vpack.c.bf16 %v2189_v59, %v2189_v59  ;;  %v1672_v14 = vadd.f32 %v4187_v46, %v496_v22  ;;  %v1614_v15 = vadd.f32 %v4189_v16, %v438_v25  ;;  %v502_v22 = vld [vmem:[#allocation2 + $0x2a0] sm:$0xff]  ;;  %v449_v25 = vld [vmem:[#allocation2 + $0xf8] sm:$0xff] }
 0x12e   : > { %v3281_v12 = vpack.c.bf16 %v2245_v60, %v2245_v60  ;;  %2805 = vst.msk [vmem:[%s4070_s9 + $0x120] sm:$0xf] %vm2732_vm4, %v3280_v3  ;;  %2752 = vst.msk [vmem:[%s4070_s9 + $0x4c] sm:$0xf] %vm2732_vm4, %v3227_v4  ;;  %v1670_v40 = vadd.f32 %v4193_v51, %v494_v38  ;;  %v1617_v20 = vadd.f32 %v4195_v24, %v441_v39  ;;  %v452_v38 = vld [vmem:[#allocation2 + $0x110] sm:$0xff]  ;;  %v3416_v39 = vpop.f32.mrb[32].mxu0 }
 0x12f   : > { %2808 = vst.msk [vmem:[%s4070_s9 + $0x12c] sm:$0xf] %vm2732_vm4, %v3283_v5  ;;  %v1673_v46 = vadd.f32 %v4197_v41, %v497_v43  ;;  %v1615_v16 = vadd.f32 %v4199_v62, %v439_v44  ;;  %2750 = vst.msk [vmem:[%s4070_s9 + $0x44] sm:$0xf] %vm2732_vm4, %v3225_v10  ;;  %v1671_v35 = vadd.f32 %v4201_v63, %v495_v52  ;;  %v447_v62 = vld [vmem:[#allocation2 + $0xe8] sm:$0xff]  ;;  %v508_v43 = vld [vmem:[#allocation2 + $0x2d0] sm:$0xff] }
 0x130   : > { %1729 = vst.msk [vmem:[#allocation2 + $0xb0] sm:$0xff] %vm305_vm2, %v1616_v6  ;;  %1785 = vst.msk [vmem:[#allocation2 + $0x270] sm:$0xff] %vm305_vm2, %v1672_v14  ;;  %v1620_v51 = vadd.f32 %v4230_v21, %v444_v53  ;;  %v1676_v24 = vadd.f32 %v4235_v29, %v500_v54  ;;  %v1618_v41 = vadd.f32 %v4237_v30, %v442_v61  ;;  %v3472_v44 = vpop.f32.mrb[32].mxu1  ;;  %v1275_v50 = vpop.f32.mrb[33].mxu0  ;;  %v506_v23 = vld [vmem:[#allocation2 + $0x2c0] sm:$0xff]  ;;  %v453_v52 = vld [vmem:[#allocation2 + $0x118] sm:$0xff] }
 0x131   : > { %2806 = vst.msk [vmem:[%s4070_s9 + $0x124] sm:$0xf] %vm2732_vm4, %v3281_v12  ;;  %v1674_v63 = vadd.f32 %v4241_v11, %v498_v0  ;;  %v1621_v21 = vadd.f32 %v4243_v42, %v445_v1  ;;  %v1677_v29 = vadd.f32 %v4245_v48, %v501_v7  ;;  %v1619_v30 = vadd.f32 %v4247_v49, %v443_v8  ;;  %v1499_v32 = vpop.f32.mrb[33].mxu1  ;;  %v3417_v53 = vpop.f32.mrb[34].mxu0  ;;  %v509_v54 = vld [vmem:[#allocation2 + $0x2d8] sm:$0xff]  ;;  %v451_v57 = vld [vmem:[#allocation2 + $0x108] sm:$0xff] }
 0x132   : > { %1727 = vst.msk [vmem:[#allocation2 + $0xa0] sm:$0xff] %vm305_vm2, %v1614_v15  ;;  %1783 = vst.msk [vmem:[#allocation2 + $0x260] sm:$0xff] %vm305_vm2, %v1670_v40  ;;  %v1675_v11 = vadd.f32 %v4249_v33, %v499_v9  ;;  %v1624_v42 = vadd.f32 %v4278_v13, %v448_v18  ;;  %v1680_v48 = vadd.f32 %v4283_v27, %v504_v19  ;;  %v3473_v58 = vpop.f32.mrb[34].mxu1  ;;  %v1278_v59 = vpop.f32.mrb[35].mxu0  ;;  %v507_v60 = vld [vmem:[#allocation2 + $0x2c8] sm:$0xff] }
 0x133   : > { %1730 = vst.msk [vmem:[#allocation2 + $0xb8] sm:$0xff] %vm305_vm2, %v1617_v20  ;;  %1786 = vst.msk [vmem:[#allocation2 + $0x278] sm:$0xff] %vm305_vm2, %v1673_v46  ;;  %v1622_v49 = vadd.f32 %v4285_v28, %v446_v31  ;;  %v1678_v33 = vadd.f32 %v4289_v45, %v502_v22  ;;  %v1625_v13 = vadd.f32 %v4291_v47, %v449_v25  ;;  %v1502_v1 = vpop.f32.mrb[35].mxu1  ;;  %v4374_v18 = vpop.f32.mrb[36].mxu0 }
 0x134   : > { %1728 = vst.msk [vmem:[#allocation2 + $0xa8] sm:$0xff] %vm305_vm2, %v1615_v16  ;;  %1784 = vst.msk [vmem:[#allocation2 + $0x268] sm:$0xff] %vm305_vm2, %v1671_v35  ;;  %v1681_v27 = vadd.f32 %v4293_v55, %v505_v34  ;;  %v1623_v28 = vadd.f32 %v4295_v56, %v447_v62  ;;  %v1679_v61 = vadd.f32 %v4297_v2, %v503_v37  ;;  %v4380_v22 = vpop.f32.mrb[36].mxu1  ;;  %v4382_v25 = vpop.f32.mrb[37].mxu0 }
 0x135   : > { %1733 = vst.msk [vmem:[#allocation2 + $0xd0] sm:$0xff] %vm305_vm2, %v1620_v51  ;;  %1789 = vst.msk [vmem:[#allocation2 + $0x290] sm:$0xff] %vm305_vm2, %v1676_v24  ;;  %v1628_v45 = vadd.f32 %v3416_v39, %v452_v38  ;;  %v1684_v0 = vadd.f32 %v3472_v44, %v508_v43  ;;  %v1626_v47 = vadd.f32 %v1275_v50, %v450_v17  ;;  %v4389_v51 = vld [vmem:[%s4827_s2] ss:$0 sm:$0xff]  ;;  %v4395_v62 = vpop.f32.mrb[38].mxu0 }
 0x136   : > { %1731 = vst.msk [vmem:[#allocation2 + $0xc0] sm:$0xff] %vm305_vm2, %v1618_v41  ;;  %1787 = vst.msk [vmem:[#allocation2 + $0x280] sm:$0xff] %vm305_vm2, %v1674_v63  ;;  %v1682_v55 = vadd.f32 %v1499_v32, %v506_v23  ;;  %v1629_v56 = vadd.f32 %v3417_v53, %v453_v52  ;;  %v1685_v3 = vadd.f32 %v3473_v58, %v509_v54  ;;  %v4400_v38 = vld [vmem:[%s4828_s3] ss:$0 sm:$0xff] }
 0x137   : > { %1734 = vst.msk [vmem:[#allocation2 + $0xd8] sm:$0xff] %vm305_vm2, %v1621_v21  ;;  %1790 = vst.msk [vmem:[#allocation2 + $0x298] sm:$0xff] %vm305_vm2, %v1677_v29  ;;  %v1627_v4 = vadd.f32 %v1278_v59, %v451_v57  ;;  %v1844_v5 = vld [vmem:[#allocation2 + $0xb0] sm:$0xff]  ;;  %v1683_v2 = vadd.f32 %v1502_v1, %v507_v60  ;;  %v4407_v29 = vpop.f32.mrb[39].mxu0 }
 0x138   : > { %1732 = vst.msk [vmem:[#allocation2 + $0xc8] sm:$0xff] %vm305_vm2, %v1619_v30  ;;  %1788 = vst.msk [vmem:[#allocation2 + $0x288] sm:$0xff] %vm305_vm2, %v1675_v11  ;;  %v1963_v6 = vmul.f32 %v4037_v26, %v1844_v5  ;;  %v1900_v7 = vld [vmem:[#allocation2 + $0x270] sm:$0xff] }
 0x139   : > { %1737 = vst.msk [vmem:[#allocation2 + $0xf0] sm:$0xff] %vm305_vm2, %v1624_v42  ;;  %1793 = vst.msk [vmem:[#allocation2 + $0x2b0] sm:$0xff] %vm305_vm2, %v1680_v48  ;;  %v1842_v8 = vld [vmem:[#allocation2 + $0xa0] sm:$0xff]  ;;  %v2019_v9 = vmul.f32 %v4037_v26, %v1900_v7 }
 0x13a   : > { %1735 = vst.msk [vmem:[#allocation2 + $0xe0] sm:$0xff] %vm305_vm2, %v1622_v49  ;;  %1791 = vst.msk [vmem:[#allocation2 + $0x2a0] sm:$0xff] %vm305_vm2, %v1678_v33  ;;  %v1961_v10 = vmul.f32 %v4037_v26, %v1842_v8  ;;  %v1898_v12 = vld [vmem:[#allocation2 + $0x260] sm:$0xff]  ;;  %v1845_v14 = vld [vmem:[#allocation2 + $0xb8] sm:$0xff]  ;;  %v2082_v19 = vadd.f32 %v4042_v36, %v1963_v6 }
 0x13b   : > { %1738 = vst.msk [vmem:[#allocation2 + $0xf8] sm:$0xff] %vm305_vm2, %v1625_v13  ;;  %1794 = vst.msk [vmem:[#allocation2 + $0x2b8] sm:$0xff] %vm305_vm2, %v1681_v27  ;;  %v1901_v15 = vld [vmem:[#allocation2 + $0x278] sm:$0xff]  ;;  %v2017_v31 = vmul.f32 %v4037_v26, %v1898_v12  ;;  %v1964_v40 = vmul.f32 %v4037_v26, %v1845_v14  ;;  %v1843_v46 = vld [vmem:[#allocation2 + $0xa8] sm:$0xff]  ;;  %v2138_v34 = vadd.f32 %v4042_v36, %v2019_v9 }
 0x13c   : > { %1736 = vst.msk [vmem:[#allocation2 + $0xe8] sm:$0xff] %vm305_vm2, %v1623_v28  ;;  %1792 = vst.msk [vmem:[#allocation2 + $0x2a8] sm:$0xff] %vm305_vm2, %v1679_v61  ;;  %v2020_v20 = vmul.f32 %v4037_v26, %v1901_v15  ;;  %v1899_v16 = vld [vmem:[#allocation2 + $0x268] sm:$0xff]  ;;  %v2080_v35 = vadd.f32 %v4042_v36, %v1961_v10  ;;  %v1962_v24 = vmul.f32 %v4389_v51, %v1843_v46  ;;  %v4393_v26 = vpop.f32.mrb[37].mxu1  ;;  %v2194_v37 = vmax.f32 %v2082_v19, 0.0  ;;  %v1848_v50 = vld [vmem:[#allocation2 + $0xd0] sm:$0xff] }
 0x13d   : > { %1741 = vst.msk [vmem:[#allocation2 + $0x110] sm:$0xff] %vm305_vm2, %v1628_v45  ;;  %1797 = vst.msk [vmem:[#allocation2 + $0x2d0] sm:$0xff] %vm305_vm2, %v1684_v0  ;;  %v2018_v41 = vmul.f32 %v4389_v51, %v1899_v16  ;;  %v2136_v36 = vadd.f32 %v4400_v38, %v2017_v31  ;;  %v2083_v39 = vadd.f32 %v4400_v38, %v1964_v40  ;;  %v4405_v21 = vpop.f32.mrb[38].mxu1  ;;  %v2250_v30 = vmax.f32 %v2138_v34, 0.0  ;;  %v1904_v32 = vld [vmem:[#allocation2 + $0x290] sm:$0xff]  ;;  %v1846_v52 = vld [vmem:[#allocation2 + $0xc0] sm:$0xff] }
 0x13e   : > { %1739 = vst.msk [vmem:[#allocation2 + $0x100] sm:$0xff] %vm305_vm2, %v1626_v47  ;;  %1795 = vst.msk [vmem:[#allocation2 + $0x2c0] sm:$0xff] %vm305_vm2, %v1682_v55  ;;  %v2139_v63 = vadd.f32 %v4400_v38, %v2020_v20  ;;  %v2192_v43 = vmax.f32 %v2080_v35, 0.0  ;;  %v2081_v44 = vadd.f32 %v4400_v38, %v1962_v24  ;;  %v4411_v23 = vpop.f32.mrb[39].mxu1  ;;  %v3230_v11 = vpack.c.bf16 %v2194_v37, %v2194_v37  ;;  %v1902_v13 = vld [vmem:[#allocation2 + $0x280] sm:$0xff]  ;;  %v1849_v27 = vld [vmem:[#allocation2 + $0xd8] sm:$0xff] }
 0x13f   : > { %1742 = vst.msk [vmem:[#allocation2 + $0x118] sm:$0xff] %vm305_vm2, %v1629_v56  ;;  %1798 = vst.msk [vmem:[#allocation2 + $0x2d8] sm:$0xff] %vm305_vm2, %v1685_v3  ;;  %v2137_v17 = vadd.f32 %v4400_v38, %v2018_v41  ;;  %v2248_v42 = vmax.f32 %v2136_v36, 0.0  ;;  %v2195_v48 = vmax.f32 %v2083_v39, 0.0  ;;  %v3286_v53 = vpack.c.bf16 %v2250_v30, %v2250_v30  ;;  %v1905_v28 = vld [vmem:[#allocation2 + $0x298] sm:$0xff]  ;;  %v1847_v45 = vld [vmem:[#allocation2 + $0xc8] sm:$0xff] }
 0x140   : > { %1740 = vst.msk [vmem:[#allocation2 + $0x108] sm:$0xff] %vm305_vm2, %v1627_v4  ;;  %1796 = vst.msk [vmem:[#allocation2 + $0x2c8] sm:$0xff] %vm305_vm2, %v1683_v2  ;;  %v2251_v49 = vmax.f32 %v2139_v63, 0.0  ;;  %v3228_v54 = vpack.c.bf16 %v2192_v43, %v2192_v43  ;;  %v2193_v57 = vmax.f32 %v2081_v44, 0.0  ;;  %v1967_v61 = vmul.f32 %v4389_v51, %v1848_v50  ;;  %v1903_v0 = vld [vmem:[#allocation2 + $0x288] sm:$0xff]  ;;  %v4422_v3 = vpop.f32.mrb[40].mxu0 }
 0x141   : > { %4835 = vst [vmem:[#allocation3_spill] sm:$0xff] %v4389_v51  ;;  %4836 = vst [vmem:[#allocation4_spill] sm:$0xff] %v4400_v38  ;;  %v2249_v33 = vmax.f32 %v2137_v17, 0.0  ;;  %v3284_v58 = vpack.c.bf16 %v2248_v42, %v2248_v42  ;;  %v3231_v59 = vpack.c.bf16 %v2195_v48, %v2195_v48  ;;  %v2023_v55 = vmul.f32 %v4389_v51, %v1904_v32  ;;  %v4434_v7 = vpop.f32.mrb[40].mxu1  ;;  %v4436_v8 = vpop.f32.mrb[41].mxu0  ;;  %v1852_v36 = vld [vmem:[#allocation2 + $0xf0] sm:$0xff] }
 0x142   : > { %2755 = vst.msk [vmem:[%s4070_s9 + $0x58] sm:$0xf] %vm2732_vm4, %v3230_v11  ;;  %v3287_v60 = vpack.c.bf16 %v2251_v49, %v2251_v49  ;;  %2811 = vst.msk [vmem:[%s4070_s9 + $0x138] sm:$0xf] %vm2732_vm4, %v3286_v53  ;;  %v3229_v47 = vpack.c.bf16 %v2193_v57, %v2193_v57  ;;  %v1965_v56 = vmul.f32 %v4389_v51, %v1846_v52  ;;  %v4446_v15 = vpop.f32.mrb[41].mxu1  ;;  %v4448_v19 = vpop.f32.mrb[42].mxu0 }
 0x143   : > { %2753 = vst.msk [vmem:[%s4070_s9 + $0x50] sm:$0xf] %vm2732_vm4, %v3228_v54  ;;  %v3285_v1 = vpack.c.bf16 %v2249_v33, %v2249_v33  ;;  %2809 = vst.msk [vmem:[%s4070_s9 + $0x130] sm:$0xf] %vm2732_vm4, %v3284_v58  ;;  %v2086_v4 = vadd.f32 %v4400_v38, %v1967_v61  ;;  %v2021_v5 = vmul.f32 %v4389_v51, %v1902_v13  ;;  %v4453_v16 = vpop.f32.mrb[42].mxu1  ;;  %v4455_v34 = vpop.f32.mrb[43].mxu0 }
 0x144   : > { %2756 = vst.msk [vmem:[%s4070_s9 + $0x5c] sm:$0xf] %vm2732_vm4, %v3231_v59  ;;  %2812 = vst.msk [vmem:[%s4070_s9 + $0x13c] sm:$0xf] %vm2732_vm4, %v3287_v60  ;;  %v1968_v2 = vmul.f32 %v4389_v51, %v1849_v27  ;;  %v2024_v6 = vmul.f32 %v4389_v51, %v1905_v28  ;;  %v2142_v9 = vadd.f32 %v4400_v38, %v2023_v55  ;;  %v4459_v39 = vpop.f32.mrb[43].mxu1  ;;  %v1908_v17 = vld [vmem:[#allocation2 + $0x2b0] sm:$0xff] }
 0x145   : > { %2754 = vst.msk [vmem:[%s4070_s9 + $0x54] sm:$0xf] %vm2732_vm4, %v3229_v47  ;;  %2810 = vst.msk [vmem:[%s4070_s9 + $0x134] sm:$0xf] %vm2732_vm4, %v3285_v1  ;;  %v2084_v10 = vadd.f32 %v4400_v38, %v1965_v56  ;;  %v1966_v12 = vmul.f32 %v4389_v51, %v1847_v45  ;;  %v2022_v14 = vmul.f32 %v4389_v51, %v1903_v0  ;;  %v2198_v31 = vmax.f32 %v2086_v4, 0.0  ;;  %v1850_v50 = vld [vmem:[#allocation2 + $0xe0] sm:$0xff] }
 0x146   : > { %v2140_v40 = vadd.f32 %v4400_v38, %v2021_v5  ;;  %v2087_v20 = vadd.f32 %v4400_v38, %v1968_v2  ;;  %v2143_v46 = vadd.f32 %v4400_v38, %v2024_v6  ;;  %v2254_v35 = vmax.f32 %v2142_v9, 0.0  ;;  %v1906_v32 = vld [vmem:[#allocation2 + $0x2a0] sm:$0xff]  ;;  %v1853_v52 = vld [vmem:[#allocation2 + $0xf8] sm:$0xff]  ;;  %v1851_v27 = vld [vmem:[#allocation2 + $0xe8] sm:$0xff]  ;;  %v4470_v45 = vpop.f32.mrb[44].mxu0  ;;  %v4482_v56 = vpop.f32.mrb[44].mxu1 }
 0x147   : > { %v2196_v24 = vmax.f32 %v2084_v10, 0.0  ;;  %v2085_v41 = vadd.f32 %v4400_v38, %v1966_v12  ;;  %v2141_v37 = vadd.f32 %v4400_v38, %v2022_v14  ;;  %v3234_v63 = vpack.c.bf16 %v2198_v31, %v2198_v31  ;;  %v1909_v53 = vld [vmem:[#allocation2 + $0x2b8] sm:$0xff]  ;;  %v1907_v28 = vld [vmem:[#allocation2 + $0x2a8] sm:$0xff]  ;;  %v4484_v4 = vpop.f32.mrb[45].mxu0  ;;  %v4494_v10 = vpop.f32.mrb[45].mxu1 }
 0x148   : > { %v2252_v30 = vmax.f32 %v2140_v40, 0.0  ;;  %v2199_v43 = vmax.f32 %v2087_v20, 0.0  ;;  %v2255_v44 = vmax.f32 %v2143_v46, 0.0  ;;  %v3290_v11 = vpack.c.bf16 %v2254_v35, %v2254_v35  ;;  %v4496_v12 = vpop.f32.mrb[46].mxu0  ;;  %v4501_v46 = vpop.f32.mrb[46].mxu1 }
 0x149   : > { %v3232_v42 = vpack.c.bf16 %v2196_v24, %v2196_v24  ;;  %v2197_v48 = vmax.f32 %v2085_v41, 0.0  ;;  %v2253_v49 = vmax.f32 %v2141_v37, 0.0  ;;  %2759 = vst.msk [vmem:[%s4070_s9 + $0x68] sm:$0xf] %vm2732_vm4, %v3234_v63  ;;  %v1971_v13 = vmul.f32 %v4389_v51, %v1852_v36  ;;  %v4503_v35 = vpop.f32.mrb[47].mxu0  ;;  %v1856_v63 = vld [vmem:[#allocation2 + $0x110] sm:$0xff] }
 0x14a   : > { %v3288_v54 = vpack.c.bf16 %v2252_v30, %v2252_v30  ;;  %v3235_v57 = vpack.c.bf16 %v2199_v43, %v2199_v43  ;;  %v3291_v33 = vpack.c.bf16 %v2255_v44, %v2255_v44  ;;  %2815 = vst.msk [vmem:[%s4070_s9 + $0x148] sm:$0xf] %vm2732_vm4, %v3290_v11  ;;  %v2027_v60 = vmul.f32 %v4389_v51, %v1908_v17  ;;  %v4507_v30 = vpop.f32.mrb[47].mxu1  ;;  %v1912_v11 = vld [vmem:[#allocation2 + $0x2d0] sm:$0xff] }
 0x14b   : > { %2757 = vst.msk [vmem:[%s4070_s9 + $0x60] sm:$0xf] %vm2732_vm4, %v3232_v42  ;;  %v3233_v58 = vpack.c.bf16 %v2197_v48, %v2197_v48  ;;  %v3289_v59 = vpack.c.bf16 %v2253_v49, %v2253_v49  ;;  %v1969_v61 = vmul.f32 %v4389_v51, %v1850_v50  ;;  %v2090_v0 = vadd.f32 %v4400_v38, %v1971_v13  ;;  %v1854_v42 = vld [vmem:[#allocation2 + $0x100] sm:$0xff] }
 0x14c   : > { %2813 = vst.msk [vmem:[%s4070_s9 + $0x140] sm:$0xf] %vm2732_vm4, %v3288_v54  ;;  %2760 = vst.msk [vmem:[%s4070_s9 + $0x6c] sm:$0xf] %vm2732_vm4, %v3235_v57  ;;  %v2025_v47 = vmul.f32 %v4389_v51, %v1906_v32  ;;  %v1972_v1 = vmul.f32 %v4389_v51, %v1853_v52  ;;  %v2028_v55 = vmul.f32 %v4389_v51, %v1909_v53  ;;  %v1910_v53 = vld [vmem:[#allocation2 + $0x2c0] sm:$0xff]  ;;  %v1857_v54 = vld [vmem:[#allocation2 + $0x118] sm:$0xff] }
 0x14d   : > { %2816 = vst.msk [vmem:[%s4070_s9 + $0x14c] sm:$0xf] %vm2732_vm4, %v3291_v33  ;;  %2758 = vst.msk [vmem:[%s4070_s9 + $0x64] sm:$0xf] %vm2732_vm4, %v3233_v58  ;;  %v2146_v5 = vadd.f32 %v4400_v38, %v2027_v60  ;;  %v2088_v2 = vadd.f32 %v4400_v38, %v1969_v61  ;;  %v1970_v6 = vmul.f32 %v4389_v51, %v1851_v27  ;;  %v2202_v14 = vmax.f32 %v2090_v0, 0.0  ;;  %v1913_v57 = vld [vmem:[#allocation2 + $0x2d8] sm:$0xff] }
 0x14e   : > { %2814 = vst.msk [vmem:[%s4070_s9 + $0x144] sm:$0xf] %vm2732_vm4, %v3289_v59  ;;  %v2026_v9 = vmul.f32 %v4389_v51, %v1907_v28  ;;  %v2144_v31 = vadd.f32 %v4400_v38, %v2025_v47  ;;  %v2091_v40 = vadd.f32 %v4400_v38, %v1972_v1  ;;  %v2147_v20 = vadd.f32 %v4400_v38, %v2028_v55  ;;  %v1855_v58 = vld [vmem:[#allocation2 + $0x108] sm:$0xff]  ;;  %v4518_v1 = vpop.f32.mrb[48].mxu0 }
 0x14f   : > { %v2258_v24 = vmax.f32 %v2146_v5, 0.0  ;;  %v2200_v41 = vmax.f32 %v2088_v2, 0.0  ;;  %v2089_v37 = vadd.f32 %v4400_v38, %v1970_v6  ;;  %v3238_v43 = vpack.c.bf16 %v2202_v14, %v2202_v14  ;;  %v1911_v59 = vld [vmem:[#allocation2 + $0x2c8] sm:$0xff]  ;;  %v4532_v14 = vpop.f32.mrb[49].mxu0 }
 0x150   : > { %v2145_v36 = vadd.f32 %v4400_v38, %v2026_v9  ;;  %v2256_v44 = vmax.f32 %v2144_v31, 0.0  ;;  %v2203_v17 = vmax.f32 %v2091_v40, 0.0  ;;  %v2259_v50 = vmax.f32 %v2147_v20, 0.0  ;;  %v4530_v9 = vpop.f32.mrb[48].mxu1 }
 0x151   : > { %v3294_v48 = vpack.c.bf16 %v2258_v24, %v2258_v24  ;;  %v3236_v49 = vpack.c.bf16 %v2200_v41, %v2200_v41  ;;  %v2201_v32 = vmax.f32 %v2089_v37, 0.0  ;;  %2763 = vst.msk [vmem:[%s4070_s9 + $0x78] sm:$0xf] %vm2732_vm4, %v3238_v43  ;;  %v1975_v28 = vmul.f32 %v4389_v51, %v1856_v63  ;;  %v4542_v41 = vpop.f32.mrb[49].mxu1  ;;  %v4544_v37 = vpop.f32.mrb[50].mxu0 }
 0x152   : > { %v2257_v52 = vmax.f32 %v2145_v36, 0.0  ;;  %v3292_v33 = vpack.c.bf16 %v2256_v44, %v2256_v44  ;;  %v3239_v13 = vpack.c.bf16 %v2203_v17, %v2203_v17  ;;  %v3295_v27 = vpack.c.bf16 %v2259_v50, %v2259_v50  ;;  %v456_v17 = vld [vmem:[#allocation2 + $0x130] sm:$0xff] }
 0x153   : > { %2819 = vst.msk [vmem:[%s4070_s9 + $0x158] sm:$0xf] %vm2732_vm4, %v3294_v48  ;;  %2761 = vst.msk [vmem:[%s4070_s9 + $0x70] sm:$0xf] %vm2732_vm4, %v3236_v49  ;;  %v3237_v60 = vpack.c.bf16 %v2201_v32, %v2201_v32  ;;  %v2031_v0 = vmul.f32 %v4389_v51, %v1912_v11  ;;  %v1973_v47 = vmul.f32 %v4389_v51, %v1854_v42  ;;  %v512_v50 = vld [vmem:[#allocation2 + $0x2f0] sm:$0xff]  ;;  %v454_v11 = vld [vmem:[#allocation2 + $0x120] sm:$0xff] }
 0x154   : > { %v3293_v61 = vpack.c.bf16 %v2257_v52, %v2257_v52  ;;  %2817 = vst.msk [vmem:[%s4070_s9 + $0x150] sm:$0xf] %vm2732_vm4, %v3292_v33  ;;  %2764 = vst.msk [vmem:[%s4070_s9 + $0x7c] sm:$0xf] %vm2732_vm4, %v3239_v13  ;;  %v2094_v55 = vadd.f32 %v4400_v38, %v1975_v28  ;;  %v2029_v5 = vmul.f32 %v4389_v51, %v1910_v53  ;;  %v4549_v42 = vpop.f32.mrb[50].mxu1  ;;  %v4551_v48 = vpop.f32.mrb[51].mxu0 }
 0x155   : > { %2820 = vst.msk [vmem:[%s4070_s9 + $0x15c] sm:$0xf] %vm2732_vm4, %v3295_v27  ;;  %v1976_v2 = vmul.f32 %v4389_v51, %v1857_v54  ;;  %v2032_v6 = vmul.f32 %v4389_v51, %v1913_v57  ;;  %2762 = vst.msk [vmem:[%s4070_s9 + $0x74] sm:$0xf] %vm2732_vm4, %v3237_v60  ;;  %v2150_v31 = vadd.f32 %v4400_v38, %v2031_v0  ;;  %v510_v54 = vld [vmem:[#allocation2 + $0x2e0] sm:$0xff]  ;;  %v457_v57 = vld [vmem:[#allocation2 + $0x138] sm:$0xff] }
 0x156   : > { %2818 = vst.msk [vmem:[%s4070_s9 + $0x154] sm:$0xf] %vm2732_vm4, %v3293_v61  ;;  %v2092_v40 = vadd.f32 %v4400_v38, %v1973_v47  ;;  %v1974_v20 = vmul.f32 %v4389_v51, %v1855_v58  ;;  %v2030_v24 = vmul.f32 %v4389_v51, %v1911_v59  ;;  %v2206_v36 = vmax.f32 %v2094_v55, 0.0  ;;  %v513_v33 = vld [vmem:[#allocation2 + $0x2f8] sm:$0xff]  ;;  %v455_v13 = vld [vmem:[#allocation2 + $0x128] sm:$0xff]  ;;  %v4555_v27 = vpop.f32.mrb[51].mxu1 }
 0x157   : > { %v2148_v63 = vadd.f32 %v4400_v38, %v2029_v5  ;;  %v2095_v43 = vadd.f32 %v4400_v38, %v1976_v2  ;;  %v2151_v44 = vadd.f32 %v4400_v38, %v2032_v6  ;;  %v2262_v49 = vmax.f32 %v2150_v31, 0.0  ;;  %v511_v61 = vld [vmem:[#allocation2 + $0x2e8] sm:$0xff]  ;;  %v460_v0 = vld [vmem:[#allocation2 + $0x150] sm:$0xff]  ;;  %v458_v55 = vld [vmem:[#allocation2 + $0x140] sm:$0xff] }
 0x158   : > { %v2204_v32 = vmax.f32 %v2092_v40, 0.0  ;;  %v2093_v52 = vadd.f32 %v4400_v38, %v1974_v20  ;;  %v2149_v53 = vadd.f32 %v4400_v38, %v2030_v24  ;;  %v3242_v28 = vpack.c.bf16 %v2206_v36, %v2206_v36  ;;  %v516_v47 = vld [vmem:[#allocation2 + $0x310] sm:$0xff]  ;;  %v514_v40 = vld [vmem:[#allocation2 + $0x300] sm:$0xff]  ;;  %v461_v20 = vld [vmem:[#allocation2 + $0x158] sm:$0xff] }
 0x159   : > { %v2260_v58 = vmax.f32 %v2148_v63, 0.0  ;;  %v2207_v59 = vmax.f32 %v2095_v43, 0.0  ;;  %v2263_v60 = vmax.f32 %v2151_v44, 0.0  ;;  %v3298_v5 = vpack.c.bf16 %v2262_v49, %v2262_v49  ;;  %v517_v24 = vld [vmem:[#allocation2 + $0x318] sm:$0xff]  ;;  %v459_v44 = vld [vmem:[#allocation2 + $0x148] sm:$0xff]  ;;  %v464_v49 = vld [vmem:[#allocation2 + $0x170] sm:$0xff] }
 0x15a   : > { %v3240_v2 = vpack.c.bf16 %v2204_v32, %v2204_v32  ;;  %v2205_v6 = vmax.f32 %v2093_v52, 0.0  ;;  %v2261_v31 = vmax.f32 %v2149_v53, 0.0  ;;  %2767 = vst.msk [vmem:[%s4070_s9 + $0x88] sm:$0xf] %vm2732_vm4, %v3242_v28  ;;  %v1632_v43 = vadd.f32 %v4374_v18, %v456_v17  ;;  %v515_v51 = vld [vmem:[#allocation2 + $0x308] sm:$0xff]  ;;  %v4566_v18 = vpop.f32.mrb[52].mxu0 }
 0x15b   : > { %v3296_v38 = vpack.c.bf16 %v2260_v58, %v2260_v58  ;;  %v3243_v36 = vpack.c.bf16 %v2207_v59, %v2207_v59  ;;  %v3299_v63 = vpack.c.bf16 %v2263_v60, %v2263_v60  ;;  %2823 = vst.msk [vmem:[%s4070_s9 + $0x168] sm:$0xf] %vm2732_vm4, %v3298_v5  ;;  %v1688_v53 = vadd.f32 %v4380_v22, %v512_v50  ;;  %v520_v58 = vld [vmem:[#allocation2 + $0x330] sm:$0xff]  ;;  %v462_v59 = vld [vmem:[#allocation2 + $0x160] sm:$0xff]  ;;  %v521_v5 = vld [vmem:[#allocation2 + $0x338] sm:$0xff] }
 0x15c   : > { %2765 = vst.msk [vmem:[%s4070_s9 + $0x80] sm:$0xf] %vm2732_vm4, %v3240_v2  ;;  %v3241_v32 = vpack.c.bf16 %v2205_v6, %v2205_v6  ;;  %v3297_v52 = vpack.c.bf16 %v2261_v31, %v2261_v31  ;;  %v1630_v28 = vadd.f32 %v4382_v25, %v454_v11  ;;  %v518_v60 = vld [vmem:[#allocation2 + $0x320] sm:$0xff]  ;;  %v1686_v17 = vadd.f32 %v4393_v26, %v510_v54  ;;  %v465_v11 = vld [vmem:[#allocation2 + $0x178] sm:$0xff]  ;;  %v463_v2 = vld [vmem:[#allocation2 + $0x168] sm:$0xff]  ;;  %v4579_v6 = vpop.f32.mrb[52].mxu1 }
 0x15d   : > { %2821 = vst.msk [vmem:[%s4070_s9 + $0x160] sm:$0xf] %vm2732_vm4, %v3296_v38  ;;  %2768 = vst.msk [vmem:[%s4070_s9 + $0x8c] sm:$0xf] %vm2732_vm4, %v3243_v36  ;;  %v1633_v22 = vadd.f32 %v4395_v62, %v457_v57  ;;  %v1689_v25 = vadd.f32 %v4405_v21, %v513_v33  ;;  %v1631_v50 = vadd.f32 %v4407_v29, %v455_v13  ;;  %v4581_v38 = vpop.f32.mrb[53].mxu0  ;;  %v519_v54 = vld [vmem:[#allocation2 + $0x328] sm:$0xff] }
 0x15e   : > { %2824 = vst.msk [vmem:[%s4070_s9 + $0x16c] sm:$0xf] %vm2732_vm4, %v3299_v63  ;;  %2766 = vst.msk [vmem:[%s4070_s9 + $0x84] sm:$0xf] %vm2732_vm4, %v3241_v32  ;;  %v1687_v26 = vadd.f32 %v4411_v23, %v511_v61  ;;  %v1636_v62 = vadd.f32 %v4422_v3, %v460_v0  ;;  %v1692_v21 = vadd.f32 %v4434_v7, %v516_v47  ;;  %v468_v57 = vld [vmem:[#allocation2 + $0x190] sm:$0xff]  ;;  %v4593_v13 = vpop.f32.mrb[53].mxu1 }
 0x15f   : > { %1745 = vst.msk [vmem:[#allocation2 + $0x130] sm:$0xff] %vm305_vm2, %v1632_v43  ;;  %1801 = vst.msk [vmem:[#allocation2 + $0x2f0] sm:$0xff] %vm305_vm2, %v1688_v53  ;;  %v1634_v29 = vadd.f32 %v4436_v8, %v458_v55  ;;  %v524_v33 = vld [vmem:[#allocation2 + $0x350] sm:$0xff]  ;;  %v4595_v31 = vpop.f32.mrb[54].mxu0  ;;  %v1690_v23 = vadd.f32 %v4446_v15, %v514_v40  ;;  %v1637_v3 = vadd.f32 %v4448_v19, %v461_v20  ;;  %v466_v61 = vld [vmem:[#allocation2 + $0x180] sm:$0xff]  ;;  %v4605_v55 = vpop.f32.mrb[54].mxu1 }
 0x160   : > { %2822 = vst.msk [vmem:[%s4070_s9 + $0x164] sm:$0xf] %vm2732_vm4, %v3297_v52  ;;  %v1693_v7 = vadd.f32 %v4453_v16, %v517_v24  ;;  %v1635_v8 = vadd.f32 %v4455_v34, %v459_v44  ;;  %v522_v0 = vld [vmem:[#allocation2 + $0x340] sm:$0xff]  ;;  %v469_v47 = vld [vmem:[#allocation2 + $0x198] sm:$0xff]  ;;  %v4607_v36 = vpop.f32.mrb[55].mxu0  ;;  %v1691_v15 = vadd.f32 %v4459_v39, %v515_v51  ;;  %v1640_v19 = vadd.f32 %v4470_v45, %v464_v49  ;;  %v467_v20 = vld [vmem:[#allocation2 + $0x188] sm:$0xff] }
 0x161   : > { %1743 = vst.msk [vmem:[#allocation2 + $0x120] sm:$0xff] %vm305_vm2, %v1630_v28  ;;  %1799 = vst.msk [vmem:[#allocation2 + $0x2e0] sm:$0xff] %vm305_vm2, %v1686_v17  ;;  %v1696_v16 = vadd.f32 %v4482_v56, %v520_v58  ;;  %v1638_v34 = vadd.f32 %v4484_v4, %v462_v59  ;;  %v525_v40 = vld [vmem:[#allocation2 + $0x358] sm:$0xff]  ;;  %v523_v24 = vld [vmem:[#allocation2 + $0x348] sm:$0xff]  ;;  %v1582_v63 = vpop.f32.mrb[55].mxu1  ;;  %v1694_v51 = vadd.f32 %v4494_v10, %v518_v60 }
 0x162   : > { %1746 = vst.msk [vmem:[#allocation2 + $0x138] sm:$0xff] %vm305_vm2, %v1633_v22  ;;  %1802 = vst.msk [vmem:[#allocation2 + $0x2f8] sm:$0xff] %vm305_vm2, %v1689_v25  ;;  %v1641_v39 = vadd.f32 %v4496_v12, %v465_v11  ;;  %v1697_v45 = vadd.f32 %v4501_v46, %v521_v5  ;;  %v1639_v56 = vadd.f32 %v4503_v35, %v463_v2  ;;  %v472_v4 = vld [vmem:[#allocation2 + $0x1b0] sm:$0xff]  ;;  %v470_v44 = vld [vmem:[#allocation2 + $0x1a0] sm:$0xff] }
 0x163   : > { %1744 = vst.msk [vmem:[#allocation2 + $0x128] sm:$0xff] %vm305_vm2, %v1631_v50  ;;  %1800 = vst.msk [vmem:[#allocation2 + $0x2e8] sm:$0xff] %vm305_vm2, %v1687_v26  ;;  %v528_v43 = vld [vmem:[#allocation2 + $0x370] sm:$0xff]  ;;  %v1695_v49 = vadd.f32 %v4507_v30, %v519_v54  ;;  %v1644_v10 = vadd.f32 %v4518_v1, %v468_v57  ;;  %v1700_v12 = vadd.f32 %v4530_v9, %v524_v33  ;;  %v526_v35 = vld [vmem:[#allocation2 + $0x360] sm:$0xff] }
 0x164   : > { %1749 = vst.msk [vmem:[#allocation2 + $0x150] sm:$0xff] %vm305_vm2, %v1636_v62  ;;  %1805 = vst.msk [vmem:[#allocation2 + $0x310] sm:$0xff] %vm305_vm2, %v1692_v21  ;;  %v1642_v46 = vadd.f32 %v4532_v14, %v466_v61  ;;  %v473_v32 = vld [vmem:[#allocation2 + $0x1b8] sm:$0xff]  ;;  %v1698_v53 = vadd.f32 %v4542_v41, %v522_v0  ;;  %v1645_v30 = vadd.f32 %v4544_v37, %v469_v47  ;;  %v471_v14 = vld [vmem:[#allocation2 + $0x1a8] sm:$0xff] }
 0x165   : > { %1747 = vst.msk [vmem:[#allocation2 + $0x140] sm:$0xff] %vm305_vm2, %v1634_v29  ;;  %1803 = vst.msk [vmem:[#allocation2 + $0x300] sm:$0xff] %vm305_vm2, %v1690_v23  ;;  %v529_v52 = vld [vmem:[#allocation2 + $0x378] sm:$0xff]  ;;  %v1701_v1 = vadd.f32 %v4549_v42, %v525_v40  ;;  %v1643_v9 = vadd.f32 %v4551_v48, %v467_v20  ;;  %v527_v28 = vld [vmem:[#allocation2 + $0x368] sm:$0xff]  ;;  %v1699_v59 = vadd.f32 %v4555_v27, %v523_v24 }
 0x166   : > { %1750 = vst.msk [vmem:[#allocation2 + $0x158] sm:$0xff] %vm305_vm2, %v1637_v3  ;;  %1806 = vst.msk [vmem:[#allocation2 + $0x318] sm:$0xff] %vm305_vm2, %v1693_v7  ;;  %v1860_v58 = vld [vmem:[#allocation2 + $0x130] sm:$0xff]  ;;  %v1648_v41 = vadd.f32 %v4566_v18, %v472_v4  ;;  %v1704_v37 = vadd.f32 %v4579_v6, %v528_v43  ;;  %v1646_v42 = vadd.f32 %v4581_v38, %v470_v44  ;;  %v4837_v48 = vld [vmem:[#allocation3_spill] sm:$0xff] }
 0x167   : > { %1748 = vst.msk [vmem:[#allocation2 + $0x148] sm:$0xff] %vm305_vm2, %v1635_v8  ;;  %1804 = vst.msk [vmem:[#allocation2 + $0x308] sm:$0xff] %vm305_vm2, %v1691_v15  ;;  %v1979_v60 = vmul.f32 %v4837_v48, %v1860_v58  ;;  %v1916_v17 = vld [vmem:[#allocation2 + $0x2f0] sm:$0xff]  ;;  %v1702_v27 = vadd.f32 %v4593_v13, %v526_v35  ;;  %v1649_v18 = vadd.f32 %v4595_v31, %v473_v32  ;;  %v4838_v62 = vld [vmem:[#allocation4_spill] sm:$0xff] }
 0x168   : > { %1753 = vst.msk [vmem:[#allocation2 + $0x170] sm:$0xff] %vm305_vm2, %v1640_v19  ;;  %1809 = vst.msk [vmem:[#allocation2 + $0x330] sm:$0xff] %vm305_vm2, %v1696_v16  ;;  %v1858_v22 = vld [vmem:[#allocation2 + $0x120] sm:$0xff]  ;;  %v1705_v25 = vadd.f32 %v4605_v55, %v529_v52  ;;  %v2035_v50 = vmul.f32 %v4837_v48, %v1916_v17  ;;  %v1647_v38 = vadd.f32 %v4607_v36, %v471_v14 }
 0x169   : > { %1751 = vst.msk [vmem:[#allocation2 + $0x160] sm:$0xff] %vm305_vm2, %v1638_v34  ;;  %1807 = vst.msk [vmem:[#allocation2 + $0x320] sm:$0xff] %vm305_vm2, %v1694_v51  ;;  %v1977_v11 = vmul.f32 %v4837_v48, %v1858_v22  ;;  %v1914_v5 = vld [vmem:[#allocation2 + $0x2e0] sm:$0xff]  ;;  %v1861_v2 = vld [vmem:[#allocation2 + $0x138] sm:$0xff]  ;;  %v1703_v26 = vadd.f32 %v1582_v63, %v527_v28  ;;  %v2098_v21 = vadd.f32 %v4838_v62, %v1979_v60 }
 0x16a   : > { %1754 = vst.msk [vmem:[#allocation2 + $0x178] sm:$0xff] %vm305_vm2, %v1641_v39  ;;  %1810 = vst.msk [vmem:[#allocation2 + $0x338] sm:$0xff] %vm305_vm2, %v1697_v45  ;;  %v1917_v6 = vld [vmem:[#allocation2 + $0x2f8] sm:$0xff]  ;;  %v2033_v29 = vmul.f32 %v4837_v48, %v1914_v5  ;;  %v1980_v54 = vmul.f32 %v4837_v48, %v1861_v2  ;;  %v1859_v33 = vld [vmem:[#allocation2 + $0x128] sm:$0xff]  ;;  %v2154_v31 = vadd.f32 %v4838_v62, %v2035_v50 }
 0x16b   : > { %1752 = vst.msk [vmem:[#allocation2 + $0x168] sm:$0xff] %vm305_vm2, %v1639_v56  ;;  %1808 = vst.msk [vmem:[#allocation2 + $0x328] sm:$0xff] %vm305_vm2, %v1695_v49  ;;  %v2036_v57 = vmul.f32 %v4837_v48, %v1917_v6  ;;  %v1915_v13 = vld [vmem:[#allocation2 + $0x2e8] sm:$0xff]  ;;  %v2096_v23 = vadd.f32 %v4838_v62, %v1977_v11  ;;  %v1978_v3 = vmul.f32 %v4837_v48, %v1859_v33  ;;  %v2210_v8 = vmax.f32 %v2098_v21, 0.0  ;;  %v1864_v16 = vld [vmem:[#allocation2 + $0x150] sm:$0xff] }
 0x16c   : > { %1757 = vst.msk [vmem:[#allocation2 + $0x190] sm:$0xff] %vm305_vm2, %v1644_v10  ;;  %1813 = vst.msk [vmem:[#allocation2 + $0x350] sm:$0xff] %vm305_vm2, %v1700_v12  ;;  %v2034_v7 = vmul.f32 %v4837_v48, %v1915_v13  ;;  %v2152_v61 = vadd.f32 %v4838_v62, %v2033_v29  ;;  %v2099_v0 = vadd.f32 %v4838_v62, %v1980_v54  ;;  %v2266_v55 = vmax.f32 %v2154_v31, 0.0  ;;  %v1920_v63 = vld [vmem:[#allocation2 + $0x310] sm:$0xff]  ;;  %v1862_v51 = vld [vmem:[#allocation2 + $0x140] sm:$0xff] }
 0x16d   : > { %1755 = vst.msk [vmem:[#allocation2 + $0x180] sm:$0xff] %vm305_vm2, %v1642_v46  ;;  %1811 = vst.msk [vmem:[#allocation2 + $0x340] sm:$0xff] %vm305_vm2, %v1698_v53  ;;  %v2155_v47 = vadd.f32 %v4838_v62, %v2036_v57  ;;  %v2208_v36 = vmax.f32 %v2096_v23, 0.0  ;;  %v2097_v15 = vadd.f32 %v4838_v62, %v1978_v3  ;;  %v3246_v34 = vpack.c.bf16 %v2210_v8, %v2210_v8  ;;  %v1918_v43 = vld [vmem:[#allocation2 + $0x300] sm:$0xff]  ;;  %v1865_v44 = vld [vmem:[#allocation2 + $0x158] sm:$0xff] }
 0x16e   : > { %1758 = vst.msk [vmem:[#allocation2 + $0x198] sm:$0xff] %vm305_vm2, %v1645_v30  ;;  %1814 = vst.msk [vmem:[#allocation2 + $0x358] sm:$0xff] %vm305_vm2, %v1701_v1  ;;  %v2153_v19 = vadd.f32 %v4838_v62, %v2034_v7  ;;  %v2264_v40 = vmax.f32 %v2152_v61, 0.0  ;;  %v2211_v20 = vmax.f32 %v2099_v0, 0.0  ;;  %v3302_v39 = vpack.c.bf16 %v2266_v55, %v2266_v55  ;;  %v1921_v49 = vld [vmem:[#allocation2 + $0x318] sm:$0xff]  ;;  %v1863_v32 = vld [vmem:[#allocation2 + $0x148] sm:$0xff] }
 0x16f   : > { %1756 = vst.msk [vmem:[#allocation2 + $0x188] sm:$0xff] %vm305_vm2, %v1643_v9  ;;  %1812 = vst.msk [vmem:[#allocation2 + $0x348] sm:$0xff] %vm305_vm2, %v1699_v59  ;;  %v2267_v24 = vmax.f32 %v2155_v47, 0.0  ;;  %v3244_v45 = vpack.c.bf16 %v2208_v36, %v2208_v36  ;;  %v2209_v56 = vmax.f32 %v2097_v15, 0.0  ;;  %v1983_v35 = vmul.f32 %v4837_v48, %v1864_v16  ;;  %v1919_v52 = vld [vmem:[#allocation2 + $0x308] sm:$0xff]  ;;  %v1868_v2 = vld [vmem:[#allocation2 + $0x170] sm:$0xff] }
 0x170   : > { %1761 = vst.msk [vmem:[#allocation2 + $0x1b0] sm:$0xff] %vm305_vm2, %v1648_v41  ;;  %1817 = vst.msk [vmem:[#allocation2 + $0x370] sm:$0xff] %vm305_vm2, %v1704_v37  ;;  %v2265_v4 = vmax.f32 %v2153_v19, 0.0  ;;  %v3300_v10 = vpack.c.bf16 %v2264_v40, %v2264_v40  ;;  %v3247_v12 = vpack.c.bf16 %v2211_v20, %v2211_v20  ;;  %v2039_v1 = vmul.f32 %v4837_v48, %v1920_v63  ;;  %v1924_v29 = vld [vmem:[#allocation2 + $0x330] sm:$0xff]  ;;  %v1866_v54 = vld [vmem:[#allocation2 + $0x160] sm:$0xff] }
 0x171   : > { %1759 = vst.msk [vmem:[#allocation2 + $0x1a0] sm:$0xff] %vm305_vm2, %v1646_v42  ;;  %1815 = vst.msk [vmem:[#allocation2 + $0x360] sm:$0xff] %vm305_vm2, %v1702_v27  ;;  %v3303_v46 = vpack.c.bf16 %v2267_v24, %v2267_v24  ;;  %v3245_v53 = vpack.c.bf16 %v2209_v56, %v2209_v56  ;;  %v1981_v9 = vmul.f32 %v4837_v48, %v1862_v51  ;;  %v1922_v23 = vld [vmem:[#allocation2 + $0x320] sm:$0xff]  ;;  %v1869_v3 = vld [vmem:[#allocation2 + $0x178] sm:$0xff] }
 0x172   : > { %1762 = vst.msk [vmem:[#allocation2 + $0x1b8] sm:$0xff] %vm305_vm2, %v1649_v18  ;;  %1818 = vst.msk [vmem:[#allocation2 + $0x378] sm:$0xff] %vm305_vm2, %v1705_v25  ;;  %v3301_v30 = vpack.c.bf16 %v2265_v4, %v2265_v4  ;;  %v2102_v14 = vadd.f32 %v4838_v62, %v1983_v35  ;;  %v2037_v28 = vmul.f32 %v4837_v48, %v1918_v43  ;;  %v1925_v7 = vld [vmem:[#allocation2 + $0x338] sm:$0xff]  ;;  %v1867_v55 = vld [vmem:[#allocation2 + $0x168] sm:$0xff] }
 0x173   : > { %1760 = vst.msk [vmem:[#allocation2 + $0x1a8] sm:$0xff] %vm305_vm2, %v1647_v38  ;;  %1816 = vst.msk [vmem:[#allocation2 + $0x368] sm:$0xff] %vm305_vm2, %v1703_v26  ;;  %v1984_v58 = vmul.f32 %v4837_v48, %v1865_v44  ;;  %v2040_v59 = vmul.f32 %v4837_v48, %v1921_v49  ;;  %v2158_v41 = vadd.f32 %v4838_v62, %v2039_v1  ;;  %v1923_v36 = vld [vmem:[#allocation2 + $0x328] sm:$0xff] }
 0x174   : > { %2771 = vst.msk [vmem:[%s4070_s9 + $0x98] sm:$0xf] %vm2732_vm4, %v3246_v34  ;;  %2827 = vst.msk [vmem:[%s4070_s9 + $0x178] sm:$0xf] %vm2732_vm4, %v3302_v39  ;;  %v2100_v37 = vadd.f32 %v4838_v62, %v1981_v9  ;;  %v1982_v42 = vmul.f32 %v4837_v48, %v1863_v32  ;;  %v2038_v60 = vmul.f32 %v4837_v48, %v1919_v52  ;;  %v2214_v17 = vmax.f32 %v2102_v14, 0.0  ;;  %v1872_v32 = vld [vmem:[#allocation2 + $0x190] sm:$0xff] }
 0x175   : > { %2769 = vst.msk [vmem:[%s4070_s9 + $0x90] sm:$0xf] %vm2732_vm4, %v3244_v45  ;;  %2825 = vst.msk [vmem:[%s4070_s9 + $0x170] sm:$0xf] %vm2732_vm4, %v3300_v10  ;;  %v2156_v22 = vadd.f32 %v4838_v62, %v2037_v28  ;;  %v2103_v27 = vadd.f32 %v4838_v62, %v1984_v58  ;;  %v2159_v18 = vadd.f32 %v4838_v62, %v2040_v59  ;;  %v2270_v25 = vmax.f32 %v2158_v41, 0.0  ;;  %v1928_v9 = vld [vmem:[#allocation2 + $0x350] sm:$0xff] }
 0x176   : > { %2772 = vst.msk [vmem:[%s4070_s9 + $0x9c] sm:$0xf] %vm2732_vm4, %v3247_v12  ;;  %2828 = vst.msk [vmem:[%s4070_s9 + $0x17c] sm:$0xf] %vm2732_vm4, %v3303_v46  ;;  %v2212_v50 = vmax.f32 %v2100_v37, 0.0  ;;  %v2101_v11 = vadd.f32 %v4838_v62, %v1982_v42  ;;  %v2157_v5 = vadd.f32 %v4838_v62, %v2038_v60  ;;  %v3250_v6 = vpack.c.bf16 %v2214_v17, %v2214_v17  ;;  %v1870_v14 = vld [vmem:[#allocation2 + $0x180] sm:$0xff] }
 0x177   : > { %2770 = vst.msk [vmem:[%s4070_s9 + $0x94] sm:$0xf] %vm2732_vm4, %v3245_v53  ;;  %2826 = vst.msk [vmem:[%s4070_s9 + $0x174] sm:$0xf] %vm2732_vm4, %v3301_v30  ;;  %v2268_v38 = vmax.f32 %v2156_v22, 0.0  ;;  %v2215_v26 = vmax.f32 %v2103_v27, 0.0  ;;  %v3306_v57 = vpack.c.bf16 %v2270_v25, %v2270_v25  ;;  %v1987_v47 = vmul.f32 %v4837_v48, %v1868_v2 }
 0x178   : > { %v2271_v21 = vmax.f32 %v2159_v18, 0.0  ;;  %v3248_v33 = vpack.c.bf16 %v2212_v50, %v2212_v50  ;;  %v2213_v13 = vmax.f32 %v2101_v11, 0.0  ;;  %v2269_v31 = vmax.f32 %v2157_v5, 0.0  ;;  %2775 = vst.msk [vmem:[%s4070_s9 + $0xa8] sm:$0xf] %vm2732_vm4, %v3250_v6  ;;  %v1926_v37 = vld [vmem:[#allocation2 + $0x340] sm:$0xff] }
 0x179   : > { %v3304_v8 = vpack.c.bf16 %v2268_v38, %v2268_v38  ;;  %v3251_v61 = vpack.c.bf16 %v2215_v26, %v2215_v26  ;;  %2831 = vst.msk [vmem:[%s4070_s9 + $0x188] sm:$0xf] %vm2732_vm4, %v3306_v57  ;;  %v2043_v16 = vmul.f32 %v4837_v48, %v1924_v29  ;;  %v1985_v34 = vmul.f32 %v4837_v48, %v1866_v54  ;;  %v1873_v42 = vld [vmem:[#allocation2 + $0x198] sm:$0xff]  ;;  %v1871_v25 = vld [vmem:[#allocation2 + $0x188] sm:$0xff] }
 0x17a   : > { %v3307_v0 = vpack.c.bf16 %v2271_v21, %v2271_v21  ;;  %2773 = vst.msk [vmem:[%s4070_s9 + $0xa0] sm:$0xf] %vm2732_vm4, %v3248_v33  ;;  %v3249_v15 = vpack.c.bf16 %v2213_v13, %v2213_v13  ;;  %v3305_v19 = vpack.c.bf16 %v2269_v31, %v2269_v31  ;;  %v2106_v40 = vadd.f32 %v4838_v62, %v1987_v47  ;;  %v1929_v60 = vld [vmem:[#allocation2 + $0x358] sm:$0xff]  ;;  %v1927_v50 = vld [vmem:[#allocation2 + $0x348] sm:$0xff] }
 0x17b   : > { %2829 = vst.msk [vmem:[%s4070_s9 + $0x180] sm:$0xf] %vm2732_vm4, %v3304_v8  ;;  %2776 = vst.msk [vmem:[%s4070_s9 + $0xac] sm:$0xf] %vm2732_vm4, %v3251_v61  ;;  %v2041_v20 = vmul.f32 %v4837_v48, %v1922_v23  ;;  %v1988_v24 = vmul.f32 %v4837_v48, %v1869_v3  ;;  %v2044_v63 = vmul.f32 %v4837_v48, %v1925_v7 }
 0x17c   : > { %2832 = vst.msk [vmem:[%s4070_s9 + $0x18c] sm:$0xf] %vm2732_vm4, %v3307_v0  ;;  %2774 = vst.msk [vmem:[%s4070_s9 + $0xa4] sm:$0xf] %vm2732_vm4, %v3249_v15  ;;  %v2162_v51 = vadd.f32 %v4838_v62, %v2043_v16  ;;  %v2104_v39 = vadd.f32 %v4838_v62, %v1985_v34  ;;  %v1986_v45 = vmul.f32 %v4837_v48, %v1867_v55  ;;  %v2218_v4 = vmax.f32 %v2106_v40, 0.0  ;;  %v1876_v55 = vld [vmem:[#allocation2 + $0x1b0] sm:$0xff] }
 0x17d   : > { %2830 = vst.msk [vmem:[%s4070_s9 + $0x184] sm:$0xf] %vm2732_vm4, %v3305_v19  ;;  %v2042_v56 = vmul.f32 %v4837_v48, %v1923_v36  ;;  %v2160_v43 = vadd.f32 %v4838_v62, %v2041_v20  ;;  %v2107_v44 = vadd.f32 %v4838_v62, %v1988_v24  ;;  %v2163_v49 = vadd.f32 %v4838_v62, %v2044_v63  ;;  %v1874_v34 = vld [vmem:[#allocation2 + $0x1a0] sm:$0xff] }
 0x17e   : > { %v2274_v10 = vmax.f32 %v2162_v51, 0.0  ;;  %v2216_v12 = vmax.f32 %v2104_v39, 0.0  ;;  %v2105_v46 = vadd.f32 %v4838_v62, %v1986_v45  ;;  %v3254_v52 = vpack.c.bf16 %v2218_v4, %v2218_v4  ;;  %v1930_v51 = vld [vmem:[#allocation2 + $0x360] sm:$0xff]  ;;  %v1877_v39 = vld [vmem:[#allocation2 + $0x1b8] sm:$0xff] }
 0x17f   : > { %v2161_v35 = vadd.f32 %v4838_v62, %v2042_v56  ;;  %v2272_v53 = vmax.f32 %v2160_v43, 0.0  ;;  %v2219_v30 = vmax.f32 %v2107_v44, 0.0  ;;  %v2275_v1 = vmax.f32 %v2163_v49, 0.0  ;;  %v1933_v45 = vld [vmem:[#allocation2 + $0x378] sm:$0xff]  ;;  %v3584_v43 = vld [vmem:[%s4827_s2] ss:$0 sm:$0xff] }
 0x180   : > { %v3310_v28 = vpack.c.bf16 %v2274_v10, %v2274_v10  ;;  %v3252_v58 = vpack.c.bf16 %v2216_v12, %v2216_v12  ;;  %v2217_v59 = vmax.f32 %v2105_v46, 0.0  ;;  %2779 = vst.msk [vmem:[%s4070_s9 + $0xb8] sm:$0xf] %vm2732_vm4, %v3254_v52  ;;  %v1991_v18 = vmul.f32 %v4837_v48, %v1872_v32  ;;  %v1875_v49 = vld [vmem:[#allocation2 + $0x1a8] sm:$0xff]  ;;  %v3585_v52 = vld [vmem:[%s4828_s3] ss:$0 sm:$0xff] }
 0x181   : > { %v2273_v41 = vmax.f32 %v2161_v35, 0.0  ;;  %v3308_v17 = vpack.c.bf16 %v2272_v53, %v2272_v53  ;;  %v3255_v22 = vpack.c.bf16 %v2219_v30, %v2219_v30  ;;  %v3311_v27 = vpack.c.bf16 %v2275_v1, %v2275_v1  ;;  %v1931_v10 = vld [vmem:[#allocation2 + $0x368] sm:$0xff] }
 0x182   : > { %2835 = vst.msk [vmem:[%s4070_s9 + $0x198] sm:$0xf] %vm2732_vm4, %v3310_v28  ;;  %2777 = vst.msk [vmem:[%s4070_s9 + $0xb0] sm:$0xf] %vm2732_vm4, %v3252_v58  ;;  %v3253_v11 = vpack.c.bf16 %v2217_v59, %v2217_v59  ;;  %v2047_v2 = vmul.f32 %v4837_v48, %v1928_v9  ;;  %v1989_v6 = vmul.f32 %v4837_v48, %v1870_v14 }
 0x183   : > { %v3309_v5 = vpack.c.bf16 %v2273_v41, %v2273_v41  ;;  %2833 = vst.msk [vmem:[%s4070_s9 + $0x190] sm:$0xf] %vm2732_vm4, %v3308_v17  ;;  %2780 = vst.msk [vmem:[%s4070_s9 + $0xbc] sm:$0xf] %vm2732_vm4, %v3255_v22  ;;  %v2110_v38 = vadd.f32 %v4838_v62, %v1991_v18  ;;  %v2045_v26 = vmul.f32 %v4837_v48, %v1926_v37 }
 0x184   : > { %2836 = vst.msk [vmem:[%s4070_s9 + $0x19c] sm:$0xf] %vm2732_vm4, %v3311_v27  ;;  %v1992_v21 = vmul.f32 %v4837_v48, %v1873_v42  ;;  %v2048_v29 = vmul.f32 %v4837_v48, %v1929_v60  ;;  %2778 = vst.msk [vmem:[%s4070_s9 + $0xb4] sm:$0xf] %vm2732_vm4, %v3253_v11  ;;  %v2166_v54 = vadd.f32 %v4838_v62, %v2047_v2 }
 0x185   : > { %2834 = vst.msk [vmem:[%s4070_s9 + $0x194] sm:$0xf] %vm2732_vm4, %v3309_v5  ;;  %v2108_v57 = vadd.f32 %v4838_v62, %v1989_v6  ;;  %v1990_v33 = vmul.f32 %v4837_v48, %v1871_v25  ;;  %v2046_v13 = vmul.f32 %v4837_v48, %v1927_v50  ;;  %v2222_v31 = vmax.f32 %v2110_v38, 0.0  ;;  %v1932_v48 = vld [vmem:[#allocation2 + $0x370] sm:$0xff] }
 0x186   : > { %v2164_v23 = vadd.f32 %v4838_v62, %v2045_v26  ;;  %v2111_v3 = vadd.f32 %v4838_v62, %v1992_v21  ;;  %v2167_v7 = vadd.f32 %v4838_v62, %v2048_v29  ;;  %v2278_v8 = vmax.f32 %v2166_v54, 0.0 }
 0x187   : > { %v2220_v61 = vmax.f32 %v2108_v57, 0.0  ;;  %v2109_v0 = vadd.f32 %v4838_v62, %v1990_v33  ;;  %v2165_v47 = vadd.f32 %v4838_v62, %v2046_v13  ;;  %v3258_v36 = vpack.c.bf16 %v2222_v31, %v2222_v31 }
 0x188   : > { %v2276_v15 = vmax.f32 %v2164_v23, 0.0  ;;  %v2223_v19 = vmax.f32 %v2111_v3, 0.0  ;;  %v2279_v16 = vmax.f32 %v2167_v7, 0.0  ;;  %v3314_v40 = vpack.c.bf16 %v2278_v8, %v2278_v8 }
 0x189   : > { %v3256_v20 = vpack.c.bf16 %v2220_v61, %v2220_v61  ;;  %v2221_v24 = vmax.f32 %v2109_v0, 0.0  ;;  %v2277_v63 = vmax.f32 %v2165_v47, 0.0  ;;  %2783 = vst.msk [vmem:[%s4070_s9 + $0xc8] sm:$0xf] %vm2732_vm4, %v3258_v36  ;;  %v1995_v44 = vmul.f32 %v3584_v43, %v1876_v55 }
 0x18a   : > { %v3312_v62 = vpack.c.bf16 %v2276_v15, %v2276_v15  ;;  %v3259_v56 = vpack.c.bf16 %v2223_v19, %v2223_v19  ;;  %v3315_v4 = vpack.c.bf16 %v2279_v16, %v2279_v16  ;;  %2839 = vst.msk [vmem:[%s4070_s9 + $0x1a8] sm:$0xf] %vm2732_vm4, %v3314_v40  ;;  %v2051_v35 = vmul.f32 %v3584_v43, %v1932_v48 }
 0x18b   : > { %2781 = vst.msk [vmem:[%s4070_s9 + $0xc0] sm:$0xf] %vm2732_vm4, %v3256_v20  ;;  %v3257_v12 = vpack.c.bf16 %v2221_v24, %v2221_v24  ;;  %v3313_v46 = vpack.c.bf16 %v2277_v63, %v2277_v63  ;;  %v1993_v32 = vmul.f32 %v3584_v43, %v1874_v34  ;;  %v2114_v53 = vadd.f32 %v3585_v52, %v1995_v44 }
 0x18c   : > { %2837 = vst.msk [vmem:[%s4070_s9 + $0x1a0] sm:$0xf] %vm2732_vm4, %v3312_v62  ;;  %2784 = vst.msk [vmem:[%s4070_s9 + $0xcc] sm:$0xf] %vm2732_vm4, %v3259_v56  ;;  %v2049_v30 = vmul.f32 %v3584_v43, %v1930_v51  ;;  %v1996_v1 = vmul.f32 %v3584_v43, %v1877_v39  ;;  %v2052_v9 = vmul.f32 %v3584_v43, %v1933_v45 }
 0x18d   : > { %2840 = vst.msk [vmem:[%s4070_s9 + $0x1ac] sm:$0xf] %vm2732_vm4, %v3315_v4  ;;  %2782 = vst.msk [vmem:[%s4070_s9 + $0xc4] sm:$0xf] %vm2732_vm4, %v3257_v12  ;;  %v2170_v14 = vadd.f32 %v3585_v52, %v2051_v35  ;;  %v2112_v28 = vadd.f32 %v3585_v52, %v1993_v32  ;;  %v1994_v58 = vmul.f32 %v3584_v43, %v1875_v49  ;;  %v2226_v41 = vmax.f32 %v2114_v53, 0.0 }
 0x18e   : > { %2838 = vst.msk [vmem:[%s4070_s9 + $0x1a4] sm:$0xf] %vm2732_vm4, %v3313_v46  ;;  %v2050_v59 = vmul.f32 %v3584_v43, %v1931_v10  ;;  %v2168_v37 = vadd.f32 %v3585_v52, %v2049_v30  ;;  %v2115_v42 = vadd.f32 %v3585_v52, %v1996_v1  ;;  %v2171_v60 = vadd.f32 %v3585_v52, %v2052_v9 }
 0x18f   : > { %v2282_v17 = vmax.f32 %v2170_v14, 0.0  ;;  %v2224_v22 = vmax.f32 %v2112_v28, 0.0  ;;  %v2113_v27 = vadd.f32 %v3585_v52, %v1994_v58  ;;  %v3262_v25 = vpack.c.bf16 %v2226_v41, %v2226_v41 }
 0x190   : > { %v2169_v18 = vadd.f32 %v3585_v52, %v2050_v59  ;;  %v2280_v50 = vmax.f32 %v2168_v37, 0.0  ;;  %v2227_v11 = vmax.f32 %v2115_v42, 0.0  ;;  %v2283_v5 = vmax.f32 %v2171_v60, 0.0 }
 0x191   : > { %v3318_v2 = vpack.c.bf16 %v2282_v17, %v2282_v17  ;;  %v3260_v6 = vpack.c.bf16 %v2224_v22, %v2224_v22  ;;  %v2225_v38 = vmax.f32 %v2113_v27, 0.0  ;;  %2787 = vst.msk [vmem:[%s4070_s9 + $0xd8] sm:$0xf] %vm2732_vm4, %v3262_v25 }
 0x192   : > { %v2281_v26 = vmax.f32 %v2169_v18, 0.0  ;;  %v3316_v21 = vpack.c.bf16 %v2280_v50, %v2280_v50  ;;  %v3263_v29 = vpack.c.bf16 %v2227_v11, %v2227_v11  ;;  %v3319_v54 = vpack.c.bf16 %v2283_v5, %v2283_v5 }
 0x193   : > { %2843 = vst.msk [vmem:[%s4070_s9 + $0x1b8] sm:$0xf] %vm2732_vm4, %v3318_v2  ;;  %2785 = vst.msk [vmem:[%s4070_s9 + $0xd0] sm:$0xf] %vm2732_vm4, %v3260_v6  ;;  %v3261_v57 = vpack.c.bf16 %v2225_v38, %v2225_v38 }
 0x194   : > { %v3317_v33 = vpack.c.bf16 %v2281_v26, %v2281_v26  ;;  %2841 = vst.msk [vmem:[%s4070_s9 + $0x1b0] sm:$0xf] %vm2732_vm4, %v3316_v21  ;;  %2788 = vst.msk [vmem:[%s4070_s9 + $0xdc] sm:$0xf] %vm2732_vm4, %v3263_v29 }
 0x195   : > { %2844 = vst.msk [vmem:[%s4070_s9 + $0x1bc] sm:$0xf] %vm2732_vm4, %v3319_v54  ;;  %2786 = vst.msk [vmem:[%s4070_s9 + $0xd4] sm:$0xf] %vm2732_vm4, %v3261_v57 }
 0x196   : > { %2842 = vst.msk [vmem:[%s4070_s9 + $0x1b4] sm:$0xf] %vm2732_vm4, %v3317_v33 }
 0x197 PF: > { %s14_s17 = sadd.s32 1, %s3608_s17   ;;  %s4839_s15 = smov %s3604_s16 }
 0x198   : > { %p11_p5 = scmp.ge.s32.totalorder %s14_s17, 30   ;;  %s4840_s16 = smov %s4842_s18 }
 0x19a   :  { %13 = sbr.rel (!%p11_p5) target bundleno = 2 (0x2), region = 83 }

</bundles_post_ra>
